<compile_context>
chip_gen: v7x
topology: tpu7x:2x2x1
jax: 0.10.0
libtpu: 0.0.40
codegen_flags: <defaults>
</compile_context>

<pallas_src>
import functools

import jax
import jax.numpy as jnp
from jax.experimental import pallas as pl
from jax.experimental.pallas import tpu as pltpu


_VMEM_LIMIT = 48 * 1024 * 1024  # safe on v7x (64 MiB/TC) and v5e/v6e (128 MiB)


# ----------------------------------------------------------------------------
# Kernels
# ----------------------------------------------------------------------------
def _fused_kernel(feat_ref, adj_ref, w1_ref, w2_ref, out_ref):
    """Whole decoder in one VMEM-resident call (small/medium graphs)."""
    y = jnp.dot(feat_ref[...], w1_ref[...],
                preferred_element_type=jnp.float32).astype(jnp.bfloat16)
    h = jnp.dot(adj_ref[...], y, preferred_element_type=jnp.float32)
    h = jnp.maximum(h, 0.0).astype(jnp.bfloat16)      # ReLU on f32, bf16 for MXU
    z = jnp.dot(h, w2_ref[...],
                preferred_element_type=jnp.float32).astype(jnp.bfloat16)
    out_ref[...] = jnp.dot(adj_ref[...], z,
                           preferred_element_type=jnp.float32).astype(out_ref.dtype)


def _feat_matmul_kernel(x_ref, w_ref, y_ref):
    # y[i_tile] = feat[i_tile] @ W1   (bf16 in, f32 accumulate, bf16 out)
    y_ref[...] = jnp.dot(
        x_ref[...], w_ref[...], preferred_element_type=jnp.float32
    ).astype(y_ref.dtype)


def _prop1_streamed_kernel(adj_ref, y_ref, w2_ref, z_ref, acc_ref):
    # z[i_tile] = relu( sum_k adj[i_tile, k_tile] @ y[k_tile] ) @ W2
    k = pl.program_id(1)

    @pl.when(k == 0)
    def _():
        acc_ref[...] = jnp.zeros_like(acc_ref)

    acc_ref[...] += jnp.dot(
        adj_ref[...], y_ref[...], preferred_element_type=jnp.float32)

    @pl.when(k == pl.num_programs(1) - 1)
    def _():
        h = jnp.maximum(acc_ref[...], 0.0).astype(w2_ref.dtype)
        z_ref[...] = jnp.dot(
            h, w2_ref[...], preferred_element_type=jnp.float32).astype(z_ref.dtype)


def _prop1_resident_kernel(adj_ref, y_ref, w2_ref, z_ref, acc_ref, *, tk):
    # y is fully VMEM-resident (constant-index BlockSpec); slice k-panel in-kernel.
    k = pl.program_id(1)

    @pl.when(k == 0)
    def _():
        acc_ref[...] = jnp.zeros_like(acc_ref)

    start = pl.multiple_of(k * tk, 128)
    acc_ref[...] += jnp.dot(
        adj_ref[...], y_ref[pl.ds(start, tk), :],
        preferred_element_type=jnp.float32)

    @pl.when(k == pl.num_programs(1) - 1)
    def _():
        h = jnp.maximum(acc_ref[...], 0.0).astype(w2_ref.dtype)
        z_ref[...] = jnp.dot(
            h, w2_ref[...], preferred_element_type=jnp.float32).astype(z_ref.dtype)


def _prop2_streamed_kernel(adj_ref, z_ref, o_ref, acc_ref):
    # out[i_tile] = sum_k adj[i_tile, k_tile] @ z[k_tile]
    k = pl.program_id(1)

    @pl.when(k == 0)
    def _():
        acc_ref[...] = jnp.zeros_like(acc_ref)

    acc_ref[...] += jnp.dot(
        adj_ref[...], z_ref[...], preferred_element_type=jnp.float32)

    @pl.when(k == pl.num_programs(1) - 1)
    def _():
        o_ref[...] = acc_ref[...].astype(o_ref.dtype)


def _prop2_resident_kernel(adj_ref, z_ref, o_ref, acc_ref, *, tk):
    k = pl.program_id(1)

    @pl.when(k == 0)
    def _():
        acc_ref[...] = jnp.zeros_like(acc_ref)

    start = pl.multiple_of(k * tk, 128)
    acc_ref[...] += jnp.dot(
        adj_ref[...], z_ref[pl.ds(start, tk), :],
        preferred_element_type=jnp.float32)

    @pl.when(k == pl.num_programs(1) - 1)
    def _():
        o_ref[...] = acc_ref[...].astype(o_ref.dtype)


# ----------------------------------------------------------------------------
# Wrapper
# ----------------------------------------------------------------------------
def _round_up(x, m):
    return (x + m - 1) // m * m


def _pick_tile(n, target):
    """Largest multiple of 128 <= target that divides n (n is a multiple of 128)."""
    t = min(max(target, 128), n)
    t -= t % 128
    while t > 128 and n % t:
        t -= 128
    return t


def _decode_fused(feat_b, adj_b, w1_b, w2_b, n_pad, in_feat, hidden, out_feat,
                  out_dtype):
    flops = 2 * (n_pad * in_feat * hidden + n_pad * n_pad * hidden
                 + n_pad * hidden * out_feat + n_pad * n_pad * out_feat)
    bytes_accessed = (2 * (n_pad * in_feat + n_pad * n_pad
                           + in_feat * hidden + hidden * out_feat)
                      + 4 * n_pad * out_feat)
    return pl.pallas_call(
        _fused_kernel,
        out_shape=jax.ShapeDtypeStruct((n_pad, out_feat), out_dtype),
        compiler_params=pltpu.CompilerParams(vmem_limit_bytes=_VMEM_LIMIT),
        cost_estimate=pl.CostEstimate(
            flops=flops, transcendentals=0, bytes_accessed=bytes_accessed),
    )(feat_b, adj_b, w1_b, w2_b)


def _decode_tiled(feat_b, adj_b, w1_b, w2_b, n_pad, in_feat, hidden, out_feat,
                  out_dtype, tm_target, tk_target, resident_max_bytes):
    # Cap tm so n_i >= 2 whenever possible -> megacore ("parallel") can shard rows.
    tm = _pick_tile(n_pad, min(tm_target, max(128, n_pad // 2)))
    tk = _pick_tile(n_pad, tk_target)
    n_i = n_pad // tm
    n_k = n_pad // tk

    cp_rows = pltpu.CompilerParams(
        dimension_semantics=("parallel",), vmem_limit_bytes=_VMEM_LIMIT)
    cp_prop = pltpu.CompilerParams(
        dimension_semantics=("parallel", "arbitrary"),
        vmem_limit_bytes=_VMEM_LIMIT)

    # ---- Pass 0: y = feat @ W1 -------------------------------------------
    y = pl.pallas_call(
        _feat_matmul_kernel,
        out_shape=jax.ShapeDtypeStruct((n_pad, hidden), jnp.bfloat16),
        grid=(n_i,),
        in_specs=[
            pl.BlockSpec((tm, in_feat), lambda i: (i, 0)),
            pl.BlockSpec((in_feat, hidden), lambda i: (0, 0)),
        ],
        out_specs=pl.BlockSpec((tm, hidden), lambda i: (i, 0)),
        compiler_params=cp_rows,
        cost_estimate=pl.CostEstimate(
            flops=2 * n_pad * in_feat * hidden,
            transcendentals=0,
            bytes_accessed=2 * (n_pad * in_feat + in_feat * hidden
                                + n_pad * hidden)),
    )(feat_b, w1_b)

    # adj streaming spec: 3-deep pipeline when the grid is long enough to benefit.
    def adj_spec():
        if n_i * n_k >= 3:
            return pl.BlockSpec((tm, tk), lambda i, k: (i, k),
                                pipeline_mode=pl.Buffered(3))
        return pl.BlockSpec((tm, tk), lambda i, k: (i, k))

    y_resident = n_pad * hidden * 2 <= resident_max_bytes
    z_resident = n_pad * out_feat * 2 <= resident_max_bytes

    # ---- Pass 1: z = relu(adj @ y) @ W2 ------------------------------------
    if y_resident:
        kern1 = functools.partial(_prop1_resident_kernel, tk=tk)
        y_spec = pl.BlockSpec((n_pad, hidden), lambda i, k: (0, 0))
        y_reads = 1
    else:
        kern1 = _prop1_streamed_kernel
        y_spec = pl.BlockSpec((tk, hidden), lambda i, k: (k, 0))
        y_reads = n_i

    z = pl.pallas_call(
        kern1,
        out_shape=jax.ShapeDtypeStruct((n_pad, out_feat), jnp.bfloat16),
        grid=(n_i, n_k),
        in_specs=[
            adj_spec(),
            y_spec,
            pl.BlockSpec((hidden, out_feat), lambda i, k: (0, 0)),
        ],
        out_specs=pl.BlockSpec((tm, out_feat), lambda i, k: (i, 0)),
        scratch_shapes=[pltpu.VMEM((tm, hidden), jnp.float32)],
        compiler_params=cp_prop,
        cost_estimate=pl.CostEstimate(
            flops=2 * (n_pad * n_pad * hidden + n_pad * hidden * out_feat),
            transcendentals=0,
            bytes_accessed=2 * (n_pad * n_pad
                                + y_reads * n_pad * hidden
                                + hidden * out_feat
                                + n_pad * out_feat)),
    )(adj_b, y, w2_b)

    # ---- Pass 2: out = adj @ z ---------------------------------------------
    if z_resident:
        kern2 = functools.partial(_prop2_resident_kernel, tk=tk)
        z_spec = pl.BlockSpec((n_pad, out_feat), lambda i, k: (0, 0))
        z_reads = 1
    else:
        kern2 = _prop2_streamed_kernel
        z_spec = pl.BlockSpec((tk, out_feat), lambda i, k: (k, 0))
        z_reads = n_i

    out = pl.pallas_call(
        kern2,
        out_shape=jax.ShapeDtypeStruct((n_pad, out_feat), out_dtype),
        grid=(n_i, n_k),
        in_specs=[adj_spec(), z_spec],
        out_specs=pl.BlockSpec((tm, out_feat), lambda i, k: (i, 0)),
        scratch_shapes=[pltpu.VMEM((tm, out_feat), jnp.float32)],
        compiler_params=cp_prop,
        cost_estimate=pl.CostEstimate(
            flops=2 * n_pad * n_pad * out_feat,
            transcendentals=0,
            bytes_accessed=2 * (n_pad * n_pad + z_reads * n_pad * out_feat)
                           + 4 * n_pad * out_feat),
    )(adj_b, z)
    return out


def decoder_forward(feat, adj, w1, w2, *,
                    tm_target=512,               # 1024 is fine on v5e/v6e
                    tk_target=1024,
                    fused_max_bytes=24 * 1024 * 1024,
                    resident_max_bytes=12 * 1024 * 1024,
                    force_tiled=False):
    n, in_feat = feat.shape
    hidden = w1.shape[1]
    out_feat = w2.shape[1]
    assert adj.shape == (n, n)
    assert w1.shape == (in_feat, hidden)
    assert w2.shape == (hidden, out_feat)
    out_dtype = feat.dtype

    # bf16 operands (MXU peak, half the HBM traffic for the N^2 adj term),
    # f32 accumulation inside the kernels.
    feat_b = feat.astype(jnp.bfloat16)
    adj_b = adj.astype(jnp.bfloat16)
    w1_b = w1.astype(jnp.bfloat16)
    w2_b = w2.astype(jnp.bfloat16)

    # Pad the node count to a multiple of 128: tiles stay (8,128)-aligned and
    # lane-dense; zero rows/cols contribute exact zeros so results match.
    n_pad = _round_up(n, 128)
    if n_pad != n:
        feat_b = jnp.pad(feat_b, ((0, n_pad - n), (0, 0)))
        adj_b = jnp.pad(adj_b, ((0, n_pad - n), (0, n_pad - n)))

    # Rough VMEM footprint of the fused single-call path.
    fused_bytes = (n_pad * n_pad * 2                                  # adj
                   + n_pad * (in_feat + hidden + out_feat) * 2        # feat,y,z bf16
                   + n_pad * (hidden + out_feat) * 4                  # f32 temps
                   + n_pad * out_feat * 4                             # out
                   + (in_feat * hidden + hidden * out_feat) * 2)      # weights

    if (not force_tiled) and fused_bytes <= fused_max_bytes:
        out = _decode_fused(feat_b, adj_b, w1_b, w2_b, n_pad,
                            in_feat, hidden, out_feat, out_dtype)
    else:
        out = _decode_tiled(feat_b, adj_b, w1_b, w2_b, n_pad,
                            in_feat, hidden, out_feat, out_dtype,
                            tm_target, tk_target, resident_max_bytes)

    return out[:n] if n_pad != n else out


# ----------------------------------------------------------------------------
# Reference + demo
# ----------------------------------------------------------------------------
def xavier_uniform(key, fan_in, fan_out, dtype=jnp.float32):
    # torch.nn.init.xavier_uniform_ : U(-a, a), a = sqrt(6 / (fan_in + fan_out))
    bound = (6.0 / (fan_in + fan_out)) ** 0.5
    return jax.random.uniform(key, (fan_in, fan_out), dtype=dtype,
                              minval=-bound, maxval=bound)


def reference_bf16(feat, adj, w1, w2):
    """Pure-JAX reference mimicking the kernel precision chain (bf16 / f32 acc)."""
    fb, ab = feat.astype(jnp.bfloat16), adj.astype(jnp.bfloat16)
    w1b, w2b = w1.astype(jnp.bfloat16), w2.astype(jnp.bfloat16)
    y = jnp.dot(fb, w1b, preferred_element_type=jnp.float32).astype(jnp.bfloat16)
    h = jnp.maximum(jnp.dot(ab, y, preferred_element_type=jnp.float32), 0.0)
    z = jnp.dot(h.astype(jnp.bfloat16), w2b,
                preferred_element_type=jnp.float32).astype(jnp.bfloat16)
    return jnp.dot(ab, z, preferred_element_type=jnp.float32)


if __name__ == "__main__":
    # Small, lane-dense shapes consistent with the module (hidden_feat default 256):
    #   N nodes = 256, in_feat = 128, hidden = 256, out_feat = 128
    N, IN_FEAT, HIDDEN, OUT_FEAT = 256, 128, 256, 128

    key = jax.random.PRNGKey(0)
    k_feat, k_adj, k_w1, k_w2 = jax.random.split(key, 4)

    feat = jax.random.normal(k_feat, (N, IN_FEAT), dtype=jnp.float32)

    # Dense, row-normalized "sparse" adjacency (so spmm == dense matmul).
    raw = jax.random.uniform(k_adj, (N, N), dtype=jnp.float32)
    adj = jnp.where(raw > 0.7, raw, 0.0) + jnp.eye(N, dtype=jnp.float32)
    adj = adj / jnp.sum(adj, axis=1, keepdims=True)

    # Deterministic xavier-uniform parameters (as in reset_parameters()).
    w1 = xavier_uniform(k_w1, IN_FEAT, HIDDEN)
    w2 = xavier_uniform(k_w2, HIDDEN, OUT_FEAT)

    ref = reference_bf16(feat, adj, w1, w2)
    ref_f32 = adj @ (jnp.maximum(adj @ (feat @ w1), 0.0) @ w2)

    # 1) Fused small-graph fast path (what graphs of this size actually run).
    out = jax.block_until_ready(decoder_forward(feat, adj, w1, w2))
    assert out.shape == (N, OUT_FEAT)
    assert jnp.allclose(out, ref, atol=1e-2, rtol=1e-2), "fused: mismatch vs bf16 ref"
    assert jnp.allclose(out, ref_f32, atol=1e-1, rtol=1e-1), "fused: mismatch vs f32 ref"

    # 2) Tiled path with VMEM-resident y/z panels (large-graph configuration).
    out_t = jax.block_until_ready(
        decoder_forward(feat, adj, w1, w2, force_tiled=True))
    assert jnp.allclose(out_t, ref, atol=1e-2, rtol=1e-2), "tiled-resident mismatch"

    # 3) Tiled path with streamed y/z k-panels (fallback configuration).
    out_s = jax.block_until_ready(
        decoder_forward(feat, adj, w1, w2, force_tiled=True, resident_max_bytes=0))
    assert jnp.allclose(out_s, ref, atol=1e-2, rtol=1e-2), "tiled-streamed mismatch"

    # 4) Node count not a multiple of 128 -> exercises the zero-padding path.
    N2 = 200
    feat2, adj2 = feat[:N2], adj[:N2, :N2]
    out2 = jax.block_until_ready(decoder_forward(feat2, adj2, w1, w2))
    ref2 = reference_bf16(feat2, adj2, w1, w2)
    assert out2.shape == (N2, OUT_FEAT)
    assert jnp.allclose(out2, ref2, atol=1e-2, rtol=1e-2), "padded-N mismatch"

    print("KERNEL_OK")
</pallas_src>

<mosaic_0001>
module attributes {stable_mosaic.version = 11 : i64} {
  func.func @_fused_kernel(%arg0: memref<256x128xbf16, #tpu.memory_space<vmem>>, %arg1: memref<256x256xbf16, #tpu.memory_space<vmem>>, %arg2: memref<128x256xbf16, #tpu.memory_space<vmem>>, %arg3: memref<256x128xbf16, #tpu.memory_space<vmem>>, %arg4: memref<256x128xf32, #tpu.memory_space<vmem>>) attributes {dimension_semantics = [], scalar_prefetch = 0 : i64, scratch_operands = 0 : i64, tpu.core_type = #tpu.core_type<tc>} {
    %c0 = arith.constant 0 : index
    %c0_0 = arith.constant 0 : index
    %0 = vector.load %arg0[%c0, %c0_0] : memref<256x128xbf16, #tpu.memory_space<vmem>>, vector<256x128xbf16>
    %c0_1 = arith.constant 0 : index
    %c0_2 = arith.constant 0 : index
    %1 = vector.load %arg2[%c0_1, %c0_2] : memref<128x256xbf16, #tpu.memory_space<vmem>>, vector<128x256xbf16>
    %cst = arith.constant dense<0.000000e+00> : vector<256x256xf32>
    %2 = tpu.matmul %0, %1, %cst {dimension_numbers = #tpu.dot_dimension_numbers<[1], [0], [0], [1], [0, 0, 1, 1], [], []>} : vector<256x128xbf16>, vector<128x256xbf16>, vector<256x256xf32> -> vector<256x256xf32>
    %3 = arith.truncf %2 : vector<256x256xf32> to vector<256x256xbf16>
    %c0_3 = arith.constant 0 : index
    %c0_4 = arith.constant 0 : index
    %4 = vector.load %arg1[%c0_3, %c0_4] : memref<256x256xbf16, #tpu.memory_space<vmem>>, vector<256x256xbf16>
    %cst_5 = arith.constant dense<0.000000e+00> : vector<256x256xf32>
    %5 = tpu.matmul %4, %3, %cst_5 {dimension_numbers = #tpu.dot_dimension_numbers<[1], [0], [0], [1], [0, 0, 1, 1], [], []>} : vector<256x256xbf16>, vector<256x256xbf16>, vector<256x256xf32> -> vector<256x256xf32>
    %cst_6 = arith.constant 0.000000e+00 : f32
    %6 = vector.broadcast %cst_6 : f32 to vector<256x256xf32>
    %7 = arith.maximumf %5, %6 : vector<256x256xf32>
    %8 = arith.truncf %7 : vector<256x256xf32> to vector<256x256xbf16>
    %c0_7 = arith.constant 0 : index
    %c0_8 = arith.constant 0 : index
    %9 = vector.load %arg3[%c0_7, %c0_8] : memref<256x128xbf16, #tpu.memory_space<vmem>>, vector<256x128xbf16>
    %cst_9 = arith.constant dense<0.000000e+00> : vector<256x128xf32>
    %10 = tpu.matmul %8, %9, %cst_9 {dimension_numbers = #tpu.dot_dimension_numbers<[1], [0], [0], [1], [0, 0, 1, 1], [], []>} : vector<256x256xbf16>, vector<256x128xbf16>, vector<256x128xf32> -> vector<256x128xf32>
    %11 = arith.truncf %10 : vector<256x128xf32> to vector<256x128xbf16>
    %c0_10 = arith.constant 0 : index
    %c0_11 = arith.constant 0 : index
    %12 = vector.load %arg1[%c0_10, %c0_11] : memref<256x256xbf16, #tpu.memory_space<vmem>>, vector<256x256xbf16>
    %cst_12 = arith.constant dense<0.000000e+00> : vector<256x128xf32>
    %13 = tpu.matmul %12, %11, %cst_12 {dimension_numbers = #tpu.dot_dimension_numbers<[1], [0], [0], [1], [0, 0, 1, 1], [], []>} : vector<256x256xbf16>, vector<256x128xbf16>, vector<256x128xf32> -> vector<256x128xf32>
    %c0_13 = arith.constant 0 : index
    %c0_14 = arith.constant 0 : index
    %14 = vector.load %arg4[%c0_13, %c0_14] : memref<256x128xf32, #tpu.memory_space<vmem>>, vector<256x128xf32>
    tpu.vector_store %arg4[%c0_13, %c0_14], %13 {strides = array<i32>} : memref<256x128xf32, #tpu.memory_space<vmem>>, vector<256x128xf32>,
    return
  }
}

</mosaic_0001>

<bundles_post_ra>
// kernel: tpu_custom_call.1
= control target key start
LH: loop header
LB: loop body
LE: loop exit
PB: predicated region body
PF: predicated region fallthrough
CT: control target
= control target key end

     0   :  { %9 = vsyncpa [#allocation3], 0  ;;  %s2362_s0 = inlined_call_operand.hbm [shape: bf16[256,128], index: 0, kind: input, shape index: {}]   ;;  %s2363_s1 = inlined_call_operand.hbm [shape: bf16[256,256], index: 1, kind: input, shape index: {}]   ;;  %s2364_s2 = inlined_call_operand.hbm [shape: bf16[128,256], index: 2, kind: input, shape index: {}]   ;;  %s2365_s3 = inlined_call_operand.hbm [shape: bf16[256,128], index: 3, kind: input, shape index: {}]   ;;  %s2366_s4 = inlined_call_operand.hbm [shape: f32[256,128], index: 4, kind: output, shape index: {}]  }
   0x1   :  { %10 = vsyncpa [#allocation6], 0 }
   0x2   :  { %11 = vsyncpa [#allocation9], 0 }
   0x3   :  { %12 = vsyncpa [#allocation4], 0  ;;  %s2073_s15 = smov [#allocation5]   ;;  %s1955_s19 = scalar_lea.hbm %s2363_s1, 4096 }
   0x4   :  { %s30_s16 = sshll.u32 %s2073_s15, 4  ;;  %p1956_p0 = scmp.ne.s32.totalorder %s2363_s1, %s1955_s19  ;;  %s31_s16 = int_to_ptr.vmem [resolvable:$true] %s30_s16 }
   0x5   :  { %p1959_p1 = scmp.lt.u32.totalorder %s1955_s19, %s2363_s1 }
   0x7   :  { %p1961_p2 = pnand %p1959_p1, %p1956_p0 }
   0x9   :  { %1964 = shalt.err (!%p1961_p2)
}
   0xa   :  { %s1965_s24 = scalar_lea.vmem %s31_s16, 4096  ;;  %p1970_p4 = scmp.lt.s32.totalorder %s31_s16, %s31_s16 }
   0xb   :  { %p1966_p3 = scmp.ne.s32.totalorder %s31_s16, %s1965_s24  ;;  %p1971_p5 = scmp.lt.s32.totalorder %s1965_s24, %s1965_s24 }
   0xd   :  { %p1972_p6 = por %p1971_p5, %p1970_p4 }
   0xf   :  { %p1973_p7 = pnand %p1972_p6, %p1966_p3 }
  0x11   :  { %1976 = shalt.err (!%p1973_p7)
}
  0x12   :  { %s2074_s25 = smov 128   ;;  %s2075_s26 = smov 8  }
  0x13   :  { %36 = dma.hbm_to_vmem [thread:$0]  %s2363_s1, 4096, %s31_s16, [#allocation6], %s2074_s25, %s2074_s25, %s2075_s26  }
  0x14   :  { %s2076_s29 = smov [#allocation2]   ;;  %s1977_s7 = scalar_lea.hbm %s2362_s0, 2048 }
  0x15   :  { %s18_s30 = sshll.u32 %s2076_s29, 4  ;;  %p1978_p8 = scmp.ne.s32.totalorder %s2362_s0, %s1977_s7  ;;  %s19_s30 = int_to_ptr.vmem [resolvable:$true] %s18_s30 }
  0x16   :  { %p1981_p9 = scmp.lt.u32.totalorder %s1977_s7, %s2362_s0 }
  0x18   :  { %p1983_p10 = pnand %p1981_p9, %p1978_p8 }
  0x1a   :  { %1986 = shalt.err (!%p1983_p10)
}
  0x1b   :  { %s1987_s12 = scalar_lea.vmem %s19_s30, 2048  ;;  %p1992_p12 = scmp.lt.s32.totalorder %s19_s30, %s19_s30 }
  0x1c   :  { %p1988_p11 = scmp.ne.s32.totalorder %s19_s30, %s1987_s12  ;;  %p1993_p13 = scmp.lt.s32.totalorder %s1987_s12, %s1987_s12 }
  0x1e   :  { %p1994_p0 = por %p1993_p13, %p1992_p12 }
  0x20   :  { %p1995_p1 = pnand %p1994_p0, %p1988_p11 }
  0x22   :  { %1998 = shalt.err (!%p1995_p1)
}
  0x23   :  { %s2077_s1 = smov 64   ;;  %s2078_s13 = smov 4  }
  0x24   :  { %24 = dma.hbm_to_vmem [thread:$0]  %s2362_s0, 2048, %s19_s30, [#allocation3], %s2077_s1, %s2077_s1, %s2078_s13  }
  0x25   :  { %s2079_s16 = smov [#allocation7]   ;;  %s2080_s18 = smov [#allocation8]  }
  0x26   :  { %s42_s17 = sshll.u32 %s2079_s16, 4  ;;  %s54_s19 = sshll.u32 %s2080_s18, 4  ;;  %s43_s17 = int_to_ptr.vmem [resolvable:$true] %s42_s17  ;;  %s2138_s19 = int_to_ptr.vmem [resolvable:$true] %s54_s19 }
  0x27   :  { %s1999_s22 = scalar_lea.hbm %s2364_s2, 2048 }
  0x28   :  { %p2000_p2 = scmp.ne.s32.totalorder %s2364_s2, %s1999_s22  ;;  %p2003_p3 = scmp.lt.u32.totalorder %s1999_s22, %s2364_s2 }
  0x2a   :  { %p2005_p4 = pnand %p2003_p3, %p2000_p2 }
  0x2c   :  { %2008 = shalt.err (!%p2005_p4)
}
  0x2d   :  { %s2009_s0 = scalar_lea.vmem %s43_s17, 2048  ;;  %p2014_p6 = scmp.lt.s32.totalorder %s43_s17, %s43_s17 }
  0x2e   :  { %p2010_p5 = scmp.ne.s32.totalorder %s43_s17, %s2009_s0  ;;  %p2015_p7 = scmp.lt.s32.totalorder %s2009_s0, %s2009_s0 }
  0x30   :  { %p2016_p8 = por %p2015_p7, %p2014_p6 }
  0x32   :  { %p2017_p9 = pnand %p2016_p8, %p2010_p5 }
  0x34   :  { %2020 = shalt.err (!%p2017_p9)
}
  0x35   :  { %48 = dma.hbm_to_vmem [thread:$0]  %s2364_s2, 2048, %s43_s17, [#allocation6], %s2074_s25, %s2074_s25, %s2075_s26  }
  0x36   :  { %s2021_s7 = scalar_lea.hbm %s2365_s3, 2048 }
  0x37   :  { %p2022_p10 = scmp.ne.s32.totalorder %s2365_s3, %s2021_s7  ;;  %p2025_p11 = scmp.lt.u32.totalorder %s2021_s7, %s2365_s3 }
  0x39   :  { %p2027_p12 = pnand %p2025_p11, %p2022_p10 }
  0x3b   :  { %2030 = shalt.err (!%p2027_p12)
}
  0x3c   :  { %s2031_s12 = scalar_lea.vmem %s2138_s19, 2048  ;;  %p2036_p0 = scmp.lt.s32.totalorder %s2138_s19, %s2138_s19 }
  0x3d   :  { %p2032_p13 = scmp.ne.s32.totalorder %s2138_s19, %s2031_s12  ;;  %p2037_p1 = scmp.lt.s32.totalorder %s2031_s12, %s2031_s12 }
  0x3f   :  { %p2038_p2 = por %p2037_p1, %p2036_p0 }
  0x41   :  { %p2039_p3 = pnand %p2038_p2, %p2032_p13 }
  0x43   :  { %2042 = shalt.err (!%p2039_p3)
}
  0x44   :  { %60 = dma.hbm_to_vmem [thread:$0]  %s2365_s3, 2048, %s2138_s19, [#allocation9], %s2077_s1, %s2077_s1, %s2078_s13  }
  0x45   :  { %2065 = dma.done.wait [#allocation3], 2048  }
  0x46   :  { %2066 = vsyncadd [#allocation3], 4294965248 }
  0x47   :  { %2067 = dma.done.wait [#allocation6], 6144  }
  0x48   :  { %2068 = vsyncadd [#allocation6], 4294961152 }
  0x49   :  { %2069 = dma.done.wait [#allocation9], 2048  }
  0x4a   :  { %2070 = vsyncadd [#allocation9], 4294965248  ;;  %v2081_v0 = vmov 0   ;;  %v1851_v1 = vld [vmem:[#allocation7 + $0x4] ss:$8 sps:$4 sm:$0xff]   ;;  %v1877_v19 = vld [vmem:[#allocation2 + $0x10] sm:$0xff]  }
  0x4b   :  { %330 = vmatprep.mubr.bf16.mxu0 %v2081_v0  ;;  %v1853_v2 = vld [vmem:[#allocation7] ss:$8 sps:$4 sm:$0xff]   ;;  %298 = vmatprep.subr.bf16.mxu0 %v1851_v1  ;;  %v1854_v3 = vld [vmem:[#allocation7 + $0x14] ss:$8 sps:$4 sm:$0xff]   ;;  %v1856_v4 = vld [vmem:[#allocation7 + $0x10] ss:$8 sps:$4 sm:$0xff]  }
  0x4c   :  { %299 = vmatpush1.bf16.msra.mxu0 %v1853_v2  ;;  %v1857_v5 = vld [vmem:[#allocation7 + $0x24] ss:$8 sps:$4 sm:$0xff]   ;;  %v1859_v6 = vld [vmem:[#allocation7 + $0x20] ss:$8 sps:$4 sm:$0xff]   ;;  %v1860_v7 = vld [vmem:[#allocation7 + $0x34] ss:$8 sps:$4 sm:$0xff]  }
  0x4d   :  { %300 = vmatprep.subr.bf16.mxu0 %v1854_v3  ;;  %v1862_v8 = vld [vmem:[#allocation7 + $0x30] ss:$8 sps:$4 sm:$0xff]   ;;  %v1863_v9 = vld [vmem:[#allocation7 + $0x44] ss:$8 sps:$4 sm:$0xff]   ;;  %v1865_v10 = vld [vmem:[#allocation7 + $0x40] ss:$8 sps:$4 sm:$0xff]  }
  0x4e   :  { %v1866_v11 = vld [vmem:[#allocation7 + $0x54] ss:$8 sps:$4 sm:$0xff]   ;;  %v1868_v12 = vld [vmem:[#allocation7 + $0x50] ss:$8 sps:$4 sm:$0xff]   ;;  %v1869_v13 = vld [vmem:[#allocation7 + $0x64] ss:$8 sps:$4 sm:$0xff]  }
  0x4f   :  { %v1871_v14 = vld [vmem:[#allocation7 + $0x60] ss:$8 sps:$4 sm:$0xff]   ;;  %v1872_v15 = vld [vmem:[#allocation7 + $0x74] ss:$8 sps:$4 sm:$0xff]   ;;  %v1874_v16 = vld [vmem:[#allocation7 + $0x70] ss:$8 sps:$4 sm:$0xff]  }
  0x50   :  { %301 = vmatpush1.bf16.msra.mxu0 %v1856_v4  ;;  %v1875_v17 = vld [vmem:[#allocation2] sm:$0xff]   ;;  %v1876_v18 = vld [vmem:[#allocation2 + $0x8] sm:$0xff]   ;;  %v1878_v20 = vld [vmem:[#allocation2 + $0x18] sm:$0xff]   ;;  %s2082_s3 = smov [#allocation10]  }
  0x51   :  { %302 = vmatprep.subr.bf16.mxu0 %v1857_v5  ;;  %v1879_v21 = vld [vmem:[#allocation2 + $0x20] sm:$0xff]   ;;  %v1880_v22 = vld [vmem:[#allocation2 + $0x28] sm:$0xff]   ;;  %v1881_v23 = vld [vmem:[#allocation2 + $0x30] sm:$0xff]   ;;  %s1507_s1 = sshll.u32 %s2082_s3, 4  ;;  %s1508_s1 = int_to_ptr.vmem [resolvable:$true] %s1507_s1 }
  0x52   :  { %v1882_v24 = vld [vmem:[#allocation2 + $0x38] sm:$0xff]   ;;  %v1883_v25 = vld [vmem:[#allocation2 + $0x40] sm:$0xff]   ;;  %v1884_v26 = vld [vmem:[#allocation2 + $0x48] sm:$0xff]   ;;  %s2043_s13 = scalar_lea.vmem %s1508_s1, 4096  ;;  %p2048_p5 = scmp.lt.s32.totalorder %s1508_s1, %s1508_s1 }
  0x53   :  { %v1885_v27 = vld [vmem:[#allocation2 + $0x50] sm:$0xff]   ;;  %v1886_v28 = vld [vmem:[#allocation2 + $0x58] sm:$0xff]   ;;  %v1887_v29 = vld [vmem:[#allocation2 + $0x60] sm:$0xff]   ;;  %p2044_p4 = scmp.ne.s32.totalorder %s1508_s1, %s2043_s13  ;;  %p2049_p6 = scmp.lt.s32.totalorder %s2043_s13, %s2043_s13 }
  0x54   :  { %303 = vmatpush1.bf16.msra.mxu0 %v1859_v6  ;;  %v1888_v30 = vld [vmem:[#allocation2 + $0x68] sm:$0xff]   ;;  %v1889_v31 = vld [vmem:[#allocation2 + $0x70] sm:$0xff]   ;;  %v1890_v32 = vld [vmem:[#allocation2 + $0x78] sm:$0xff]  }
  0x55   :  { %304 = vmatprep.subr.bf16.mxu0 %v1860_v7  ;;  %v2191_v33 = vld [vmem:[#allocation5 + $0x4] ss:$8 sps:$4 sm:$0xff]   ;;  %p2050_p7 = por %p2049_p6, %p2048_p5 }
  0x56   :  { %747 = vmatprep.mubr.bf16.mxu1 %v2191_v33 }
  0x57   :  { %p2051_p8 = pnand %p2050_p7, %p2044_p4 }
  0x58   :  { %305 = vmatpush1.bf16.msra.mxu0 %v1862_v8 }
  0x59   :  { %306 = vmatprep.subr.bf16.mxu0 %v1863_v9 }
  0x5c   :  { %307 = vmatpush1.bf16.msra.mxu0 %v1865_v10 }
  0x5d   :  { %308 = vmatprep.subr.bf16.mxu0 %v1866_v11 }
  0x60   :  { %309 = vmatpush1.bf16.msra.mxu0 %v1868_v12 }
  0x61   :  { %310 = vmatprep.subr.bf16.mxu0 %v1869_v13 }
  0x64   :  { %311 = vmatpush1.bf16.msra.mxu0 %v1871_v14 }
  0x65   :  { %312 = vmatprep.subr.bf16.mxu0 %v1872_v15 }
  0x68   :  { %313 = vmatpush1.bf16.msra.mxu0 %v1874_v16 }
  0x6b   :  { %331 = vmatmul.mubr.bf16.vlgmr.msra.gmra.mrb[0].mxu0 %v1875_v17 }
  0x6c   :  { %340 = vmatprep.mubr.bf16.mxu0 %v2081_v0 }
  0x73   :  { %341 = vmatmul.mubr.bf16.gmra.mrb[4].mxu0 %v1876_v18 }
  0x74   :  { %350 = vmatprep.mubr.bf16.mxu0 %v2081_v0 }
  0x7b   :  { %351 = vmatmul.mubr.bf16.gmra.mrb[8].mxu0 %v1877_v19 }
  0x7c   :  { %360 = vmatprep.mubr.bf16.mxu0 %v2081_v0 }
  0x83   :  { %361 = vmatmul.mubr.bf16.gmra.mrb[12].mxu0 %v1878_v20 }
  0x84   :  { %370 = vmatprep.mubr.bf16.mxu0 %v2081_v0 }
  0x8b   :  { %371 = vmatmul.mubr.bf16.gmra.mrb[16].mxu0 %v1879_v21 }
  0x8c   :  { %380 = vmatprep.mubr.bf16.mxu0 %v2081_v0 }
  0x93   :  { %381 = vmatmul.mubr.bf16.gmra.mrb[20].mxu0 %v1880_v22 }
  0x94   :  { %390 = vmatprep.mubr.bf16.mxu0 %v2081_v0 }
  0x9b   :  { %391 = vmatmul.mubr.bf16.gmra.mrb[24].mxu0 %v1881_v23 }
  0x9c   :  { %400 = vmatprep.mubr.bf16.mxu0 %v2081_v0 }
  0xa3   :  { %401 = vmatmul.mubr.bf16.gmra.mrb[28].mxu0 %v1882_v24 }
  0xa4   :  { %410 = vmatprep.mubr.bf16.mxu0 %v2081_v0 }
  0xab   :  { %411 = vmatmul.mubr.bf16.gmra.mrb[32].mxu0 %v1883_v25 }
  0xac   :  { %420 = vmatprep.mubr.bf16.mxu0 %v2081_v0 }
  0xb3   :  { %421 = vmatmul.mubr.bf16.gmra.mrb[36].mxu0 %v1884_v26 }
  0xb4   :  { %430 = vmatprep.mubr.bf16.mxu0 %v2081_v0 }
  0xbb   :  { %431 = vmatmul.mubr.bf16.gmra.mrb[40].mxu0 %v1885_v27 }
  0xbc   :  { %440 = vmatprep.mubr.bf16.mxu0 %v2081_v0 }
  0xc3   :  { %441 = vmatmul.mubr.bf16.gmra.mrb[44].mxu0 %v1886_v28 }
  0xc4   :  { %450 = vmatprep.mubr.bf16.mxu0 %v2081_v0 }
  0xcb   :  { %451 = vmatmul.mubr.bf16.gmra.mrb[48].mxu0 %v1887_v29 }
  0xcc   :  { %460 = vmatprep.mubr.bf16.mxu0 %v2081_v0 }
  0xd3   :  { %461 = vmatmul.mubr.bf16.gmra.mrb[52].mxu0 %v1888_v30 }
  0xd4   :  { %470 = vmatprep.mubr.bf16.mxu0 %v2081_v0 }
  0xdb   :  { %471 = vmatmul.mubr.bf16.gmra.mrb[56].mxu0 %v1889_v31 }
  0xdc   :  { %480 = vmatprep.mubr.bf16.mxu0 %v2081_v0 }
  0xe3   :  { %481 = vmatmul.mubr.bf16.gmra.mrb[60].mxu0 %v1890_v32 }
 0x13e   :  { %v332_v34 = vpop.f32.mrb[0].mxu0 }
 0x13f   :  { %v334_v35 = vpop.f32.mrb[1].mxu0 }
 0x140   :  { %v336_v36 = vpop.f32.mrb[2].mxu0 }
 0x141   :  { %v491_v37 = vpack.c.bf16 %v336_v36, %v332_v34  ;;  %v338_v38 = vpop.f32.mrb[3].mxu0 }
 0x142   :  { %v492_v39 = vpack.c.bf16 %v338_v38, %v334_v35 }
 0x144   :  { %715 = vmatprep.subr.bf16.mxu1 %v492_v39 }
 0x145   :  { %716 = vmatpush1.bf16.msra.mxu1 %v491_v37 }
 0x146   :  { %v342_v40 = vpop.f32.mrb[4].mxu0 }
 0x147   :  { %v344_v41 = vpop.f32.mrb[5].mxu0 }
 0x148   :  { %v346_v42 = vpop.f32.mrb[6].mxu0 }
 0x149   :  { %v493_v43 = vpack.c.bf16 %v346_v42, %v342_v40  ;;  %v348_v44 = vpop.f32.mrb[7].mxu0 }
 0x14a   :  { %v494_v45 = vpack.c.bf16 %v348_v44, %v344_v41 }
 0x14c   :  { %717 = vmatprep.subr.bf16.mxu1 %v494_v45 }
 0x14d   :  { %718 = vmatpush1.bf16.msra.mxu1 %v493_v43 }
 0x14e   :  { %v352_v46 = vpop.f32.mrb[8].mxu0 }
 0x14f   :  { %v354_v47 = vpop.f32.mrb[9].mxu0 }
 0x150   :  { %v356_v48 = vpop.f32.mrb[10].mxu0 }
 0x151   :  { %v495_v49 = vpack.c.bf16 %v356_v48, %v352_v46  ;;  %v358_v50 = vpop.f32.mrb[11].mxu0 }
 0x152   :  { %v496_v51 = vpack.c.bf16 %v358_v50, %v354_v47 }
 0x154   :  { %719 = vmatprep.subr.bf16.mxu1 %v496_v51 }
 0x155   :  { %720 = vmatpush1.bf16.msra.mxu1 %v495_v49 }
 0x156   :  { %v362_v52 = vpop.f32.mrb[12].mxu0 }
 0x157   :  { %v364_v53 = vpop.f32.mrb[13].mxu0 }
 0x158   :  { %v366_v54 = vpop.f32.mrb[14].mxu0 }
 0x159   :  { %v497_v55 = vpack.c.bf16 %v366_v54, %v362_v52  ;;  %v368_v56 = vpop.f32.mrb[15].mxu0 }
 0x15a   :  { %v498_v57 = vpack.c.bf16 %v368_v56, %v364_v53 }
 0x15c   :  { %721 = vmatprep.subr.bf16.mxu1 %v498_v57 }
 0x15d   :  { %722 = vmatpush1.bf16.msra.mxu1 %v497_v55 }
 0x15e   :  { %v372_v58 = vpop.f32.mrb[16].mxu0 }
 0x15f   :  { %v374_v59 = vpop.f32.mrb[17].mxu0 }
 0x160   :  { %v376_v60 = vpop.f32.mrb[18].mxu0 }
 0x161   :  { %v499_v61 = vpack.c.bf16 %v376_v60, %v372_v58  ;;  %v378_v62 = vpop.f32.mrb[19].mxu0 }
 0x162   :  { %v500_v63 = vpack.c.bf16 %v378_v62, %v374_v59 }
 0x164   :  { %723 = vmatprep.subr.bf16.mxu1 %v500_v63 }
 0x165   :  { %724 = vmatpush1.bf16.msra.mxu1 %v499_v61 }
 0x166   :  { %v382_v0 = vpop.f32.mrb[20].mxu0 }
 0x167   :  { %v384_v1 = vpop.f32.mrb[21].mxu0 }
 0x168   :  { %v386_v2 = vpop.f32.mrb[22].mxu0 }
 0x169   :  { %v501_v3 = vpack.c.bf16 %v386_v2, %v382_v0  ;;  %v388_v4 = vpop.f32.mrb[23].mxu0  ;;  %v1939_v0 = vld [vmem:[#allocation8 + $0x40] sm:$0xff]   ;;  %v1941_v2 = vld [vmem:[#allocation8 + $0x48] sm:$0xff]  }
 0x16a   :  { %v502_v5 = vpack.c.bf16 %v388_v4, %v384_v1  ;;  %v1940_v1 = vld [vmem:[#allocation8] sm:$0xff]   ;;  %1601 = vmatprep.subr.bf16.mxu0 %v1939_v0 }
 0x16b   :  { %1602 = vmatpush3.bf16.msra.mxu0 %v1940_v1 }
 0x16c   :  { %725 = vmatprep.subr.bf16.mxu1 %v502_v5  ;;  %1603 = vmatprep.subr.bf16.mxu0 %v1941_v2 }
 0x16d   :  { %726 = vmatpush1.bf16.msra.mxu1 %v501_v3 }
 0x16e   :  { %v392_v6 = vpop.f32.mrb[24].mxu0 }
 0x16f   :  { %v394_v7 = vpop.f32.mrb[25].mxu0 }
 0x170   :  { %v396_v8 = vpop.f32.mrb[26].mxu0 }
 0x171   :  { %v503_v9 = vpack.c.bf16 %v396_v8, %v392_v6  ;;  %v398_v10 = vpop.f32.mrb[27].mxu0  ;;  %v1942_v6 = vld [vmem:[#allocation8 + $0x8] sm:$0xff]   ;;  %v1943_v8 = vld [vmem:[#allocation8 + $0x50] sm:$0xff]  }
 0x172   :  { %v504_v11 = vpack.c.bf16 %v398_v10, %v394_v7  ;;  %v2194_v7 = vld [vmem:[#allocation5] ss:$8 sps:$4 sm:$0xff]   ;;  %1604 = vmatpush3.bf16.msra.mxu0 %v1942_v6  ;;  %v1944_v10 = vld [vmem:[#allocation8 + $0x10] sm:$0xff]  }
 0x173   :  { %1605 = vmatprep.subr.bf16.mxu0 %v1943_v8 }
 0x174   :  { %727 = vmatprep.subr.bf16.mxu1 %v504_v11  ;;  %v1945_v11 = vld [vmem:[#allocation8 + $0x58] sm:$0xff]  }
 0x175   :  { %728 = vmatpush1.bf16.msra.mxu1 %v503_v9  ;;  %v2196_v9 = vld [vmem:[#allocation5 + $0x14] ss:$8 sps:$4 sm:$0xff]  }
 0x176   :  { %v402_v12 = vpop.f32.mrb[28].mxu0  ;;  %1606 = vmatpush3.bf16.msra.mxu0 %v1944_v10 }
 0x177   :  { %v404_v13 = vpop.f32.mrb[29].mxu0  ;;  %1607 = vmatprep.subr.bf16.mxu0 %v1945_v11 }
 0x178   :  { %v406_v14 = vpop.f32.mrb[30].mxu0 }
 0x179   :  { %v505_v15 = vpack.c.bf16 %v406_v14, %v402_v12  ;;  %v408_v16 = vpop.f32.mrb[31].mxu0  ;;  %v1946_v12 = vld [vmem:[#allocation8 + $0x18] sm:$0xff]   ;;  %v1947_v14 = vld [vmem:[#allocation8 + $0x60] sm:$0xff]  }
 0x17a   :  { %v506_v17 = vpack.c.bf16 %v408_v16, %v404_v13  ;;  %v2200_v13 = vld [vmem:[#allocation5 + $0x10] ss:$8 sps:$4 sm:$0xff]   ;;  %1608 = vmatpush3.bf16.msra.mxu0 %v1946_v12  ;;  %v1948_v16 = vld [vmem:[#allocation8 + $0x20] sm:$0xff]  }
 0x17b   :  { %1609 = vmatprep.subr.bf16.mxu0 %v1947_v14 }
 0x17c   :  { %729 = vmatprep.subr.bf16.mxu1 %v506_v17  ;;  %v1949_v17 = vld [vmem:[#allocation8 + $0x68] sm:$0xff]  }
 0x17d   :  { %730 = vmatpush1.bf16.msra.mxu1 %v505_v15  ;;  %v2202_v15 = vld [vmem:[#allocation5 + $0x24] ss:$8 sps:$4 sm:$0xff]  }
 0x17e   :  { %v412_v18 = vpop.f32.mrb[32].mxu0  ;;  %1610 = vmatpush3.bf16.msra.mxu0 %v1948_v16 }
 0x17f   :  { %v414_v19 = vpop.f32.mrb[33].mxu0  ;;  %1611 = vmatprep.subr.bf16.mxu0 %v1949_v17 }
 0x180   :  { %v416_v20 = vpop.f32.mrb[34].mxu0 }
 0x181   :  { %v507_v21 = vpack.c.bf16 %v416_v20, %v412_v18  ;;  %v418_v22 = vpop.f32.mrb[35].mxu0  ;;  %v1950_v18 = vld [vmem:[#allocation8 + $0x28] sm:$0xff]   ;;  %v2208_v20 = vld [vmem:[#allocation5 + $0x34] ss:$8 sps:$4 sm:$0xff]  }
 0x182   :  { %v508_v23 = vpack.c.bf16 %v418_v22, %v414_v19  ;;  %v2206_v19 = vld [vmem:[#allocation5 + $0x20] ss:$8 sps:$4 sm:$0xff]   ;;  %1612 = vmatpush3.bf16.msra.mxu0 %v1950_v18  ;;  %v2214_v22 = vld [vmem:[#allocation5 + $0x44] ss:$8 sps:$4 sm:$0xff]  }
 0x184   :  { %731 = vmatprep.subr.bf16.mxu1 %v508_v23  ;;  %v2218_v23 = vld [vmem:[#allocation5 + $0x40] ss:$8 sps:$4 sm:$0xff]  }
 0x185   :  { %732 = vmatpush1.bf16.msra.mxu1 %v507_v21  ;;  %v2212_v21 = vld [vmem:[#allocation5 + $0x30] ss:$8 sps:$4 sm:$0xff]  }
 0x186   :  { %v422_v24 = vpop.f32.mrb[36].mxu0 }
 0x187   :  { %v424_v25 = vpop.f32.mrb[37].mxu0 }
 0x188   :  { %v426_v26 = vpop.f32.mrb[38].mxu0 }
 0x189   :  { %v509_v27 = vpack.c.bf16 %v426_v26, %v422_v24  ;;  %v428_v28 = vpop.f32.mrb[39].mxu0  ;;  %v2220_v24 = vld [vmem:[#allocation5 + $0x54] ss:$8 sps:$4 sm:$0xff]   ;;  %v2226_v26 = vld [vmem:[#allocation5 + $0x64] ss:$8 sps:$4 sm:$0xff]  }
 0x18a   :  { %v510_v29 = vpack.c.bf16 %v428_v28, %v424_v25  ;;  %v2224_v25 = vld [vmem:[#allocation5 + $0x50] ss:$8 sps:$4 sm:$0xff]   ;;  %v2232_v28 = vld [vmem:[#allocation5 + $0x74] ss:$8 sps:$4 sm:$0xff]  }
 0x18c   :  { %733 = vmatprep.subr.bf16.mxu1 %v510_v29  ;;  %v2236_v29 = vld [vmem:[#allocation5 + $0x70] ss:$8 sps:$4 sm:$0xff]  }
 0x18d   :  { %734 = vmatpush1.bf16.msra.mxu1 %v509_v27  ;;  %v2230_v27 = vld [vmem:[#allocation5 + $0x60] ss:$8 sps:$4 sm:$0xff]  }
 0x18e   :  { %v432_v30 = vpop.f32.mrb[40].mxu0 }
 0x18f   :  { %v434_v31 = vpop.f32.mrb[41].mxu0 }
 0x190   :  { %v436_v32 = vpop.f32.mrb[42].mxu0 }
 0x191   :  { %v511_v34 = vpack.c.bf16 %v436_v32, %v432_v30  ;;  %v438_v35 = vpop.f32.mrb[43].mxu0  ;;  %v2238_v30 = vld [vmem:[#allocation5 + $0x84] ss:$8 sps:$4 sm:$0xff]   ;;  %v2244_v32 = vld [vmem:[#allocation5 + $0x94] ss:$8 sps:$4 sm:$0xff]  }
 0x192   :  { %v512_v36 = vpack.c.bf16 %v438_v35, %v434_v31  ;;  %v2242_v31 = vld [vmem:[#allocation5 + $0x80] ss:$8 sps:$4 sm:$0xff]   ;;  %v2250_v35 = vld [vmem:[#allocation5 + $0xa4] ss:$8 sps:$4 sm:$0xff]  }
 0x194   :  { %735 = vmatprep.subr.bf16.mxu1 %v512_v36  ;;  %v2254_v36 = vld [vmem:[#allocation5 + $0xa0] ss:$8 sps:$4 sm:$0xff]  }
 0x195   :  { %736 = vmatpush1.bf16.msra.mxu1 %v511_v34  ;;  %v2248_v34 = vld [vmem:[#allocation5 + $0x90] ss:$8 sps:$4 sm:$0xff]  }
 0x196   :  { %v442_v37 = vpop.f32.mrb[44].mxu0 }
 0x197   :  { %v444_v38 = vpop.f32.mrb[45].mxu0 }
 0x198   :  { %v446_v39 = vpop.f32.mrb[46].mxu0 }
 0x199   :  { %v513_v40 = vpack.c.bf16 %v446_v39, %v442_v37  ;;  %v448_v41 = vpop.f32.mrb[47].mxu0  ;;  %v2256_v37 = vld [vmem:[#allocation5 + $0xb4] ss:$8 sps:$4 sm:$0xff]  }
 0x19a   :  { %v514_v42 = vpack.c.bf16 %v448_v41, %v444_v38  ;;  %v1951_v38 = vld [vmem:[#allocation8 + $0x70] sm:$0xff]   ;;  %v2262_v41 = vld [vmem:[#allocation5 + $0xc4] ss:$8 sps:$4 sm:$0xff]  }
 0x19b   :  { %v1952_v39 = vld [vmem:[#allocation8 + $0x30] sm:$0xff]   ;;  %1613 = vmatprep.subr.bf16.mxu0 %v1951_v38 }
 0x19c   :  { %737 = vmatprep.subr.bf16.mxu1 %v514_v42  ;;  %1614 = vmatpush3.bf16.msra.mxu0 %v1952_v39  ;;  %v1953_v42 = vld [vmem:[#allocation8 + $0x78] sm:$0xff]  }
 0x19d   :  { %738 = vmatpush1.bf16.msra.mxu1 %v513_v40  ;;  %v2260_v40 = vld [vmem:[#allocation5 + $0xb0] ss:$8 sps:$4 sm:$0xff]   ;;  %1615 = vmatprep.subr.bf16.mxu0 %v1953_v42 }
 0x19e   :  { %v452_v43 = vpop.f32.mrb[48].mxu0 }
 0x19f   :  { %v454_v44 = vpop.f32.mrb[49].mxu0 }
 0x1a0   :  { %v456_v45 = vpop.f32.mrb[50].mxu0 }
 0x1a1   :  { %v515_v46 = vpack.c.bf16 %v456_v45, %v452_v43  ;;  %v458_v47 = vpop.f32.mrb[51].mxu0  ;;  %v1954_v43 = vld [vmem:[#allocation8 + $0x38] sm:$0xff]  }
 0x1a2   :  { %v516_v48 = vpack.c.bf16 %v458_v47, %v454_v44  ;;  %1616 = vmatpush3.bf16.msra.mxu0 %v1954_v43  ;;  %v2266_v44 = vld [vmem:[#allocation5 + $0xc0] ss:$8 sps:$4 sm:$0xff]   ;;  %v2268_v45 = vld [vmem:[#allocation5 + $0xd4] ss:$8 sps:$4 sm:$0xff]   ;;  %v2274_v47 = vld [vmem:[#allocation5 + $0xe4] ss:$8 sps:$4 sm:$0xff]  }
 0x1a4   :  { %739 = vmatprep.subr.bf16.mxu1 %v516_v48  ;;  %v2278_v48 = vld [vmem:[#allocation5 + $0xe0] ss:$8 sps:$4 sm:$0xff]  }
 0x1a5   :  { %740 = vmatpush1.bf16.msra.mxu1 %v515_v46  ;;  %v2272_v46 = vld [vmem:[#allocation5 + $0xd0] ss:$8 sps:$4 sm:$0xff]  }
 0x1a6   :  { %v462_v49 = vpop.f32.mrb[52].mxu0 }
 0x1a7   :  { %v464_v50 = vpop.f32.mrb[53].mxu0 }
 0x1a8   :  { %v466_v51 = vpop.f32.mrb[54].mxu0 }
 0x1a9   :  { %v517_v52 = vpack.c.bf16 %v466_v51, %v462_v49  ;;  %v468_v53 = vpop.f32.mrb[55].mxu0  ;;  %v2280_v49 = vld [vmem:[#allocation5 + $0xf4] ss:$8 sps:$4 sm:$0xff]  }
 0x1aa   :  { %v518_v54 = vpack.c.bf16 %v468_v53, %v464_v50  ;;  %v2284_v50 = vld [vmem:[#allocation5 + $0xf0] ss:$8 sps:$4 sm:$0xff]  }
 0x1ac   :  { %741 = vmatprep.subr.bf16.mxu1 %v518_v54 }
 0x1ad   :  { %742 = vmatpush1.bf16.msra.mxu1 %v517_v52 }
 0x1ae   :  { %v472_v55 = vpop.f32.mrb[56].mxu0 }
 0x1af   :  { %v474_v56 = vpop.f32.mrb[57].mxu0 }
 0x1b0   :  { %v476_v57 = vpop.f32.mrb[58].mxu0 }
 0x1b1   :  { %v519_v58 = vpack.c.bf16 %v476_v57, %v472_v55  ;;  %v478_v59 = vpop.f32.mrb[59].mxu0 }
 0x1b2   :  { %v520_v60 = vpack.c.bf16 %v478_v59, %v474_v56 }
 0x1b4   :  { %743 = vmatprep.subr.bf16.mxu1 %v520_v60 }
 0x1b5   :  { %744 = vmatpush1.bf16.msra.mxu1 %v519_v58 }
 0x1b6   :  { %v482_v61 = vpop.f32.mrb[60].mxu0 }
 0x1b7   :  { %v484_v62 = vpop.f32.mrb[61].mxu0 }
 0x1b8   :  { %v486_v63 = vpop.f32.mrb[62].mxu0 }
 0x1b9   :  { %v521_v3 = vpack.c.bf16 %v486_v63, %v482_v61  ;;  %v488_v4 = vpop.f32.mrb[63].mxu0 }
 0x1ba   :  { %v522_v5 = vpack.c.bf16 %v488_v4, %v484_v62 }
 0x1bc   :  { %745 = vmatprep.subr.bf16.mxu1 %v522_v5 }
 0x1bd   :  { %746 = vmatpush1.bf16.msra.mxu1 %v521_v3 }
 0x1c0   :  { %748 = vmatmul.mubr.bf16.vlgmr.msra.gmra.mrb[0].mxu1 %v2194_v7 }
 0x1c1   :  { %757 = vmatprep.mubr.bf16.mxu1 %v2196_v9 }
 0x1c8   :  { %758 = vmatmul.mubr.bf16.gmra.mrb[4].mxu1 %v2200_v13 }
 0x1c9   :  { %767 = vmatprep.mubr.bf16.mxu1 %v2202_v15 }
 0x1d0   :  { %768 = vmatmul.mubr.bf16.gmra.mrb[8].mxu1 %v2206_v19 }
 0x1d1   :  { %777 = vmatprep.mubr.bf16.mxu1 %v2208_v20 }
 0x1d8   :  { %778 = vmatmul.mubr.bf16.gmra.mrb[12].mxu1 %v2212_v21 }
 0x1d9   :  { %787 = vmatprep.mubr.bf16.mxu1 %v2214_v22 }
 0x1e0   :  { %788 = vmatmul.mubr.bf16.gmra.mrb[16].mxu1 %v2218_v23 }
 0x1e1   :  { %797 = vmatprep.mubr.bf16.mxu1 %v2220_v24 }
 0x1e8   :  { %798 = vmatmul.mubr.bf16.gmra.mrb[20].mxu1 %v2224_v25 }
 0x1e9   :  { %807 = vmatprep.mubr.bf16.mxu1 %v2226_v26 }
 0x1f0   :  { %808 = vmatmul.mubr.bf16.gmra.mrb[24].mxu1 %v2230_v27 }
 0x1f1   :  { %817 = vmatprep.mubr.bf16.mxu1 %v2232_v28 }
 0x1f8   :  { %818 = vmatmul.mubr.bf16.gmra.mrb[28].mxu1 %v2236_v29 }
 0x1f9   :  { %827 = vmatprep.mubr.bf16.mxu1 %v2238_v30 }
 0x200   :  { %828 = vmatmul.mubr.bf16.gmra.mrb[32].mxu1 %v2242_v31 }
 0x201   :  { %837 = vmatprep.mubr.bf16.mxu1 %v2244_v32 }
 0x208   :  { %838 = vmatmul.mubr.bf16.gmra.mrb[36].mxu1 %v2248_v34 }
 0x209   :  { %847 = vmatprep.mubr.bf16.mxu1 %v2250_v35 }
 0x210   :  { %848 = vmatmul.mubr.bf16.gmra.mrb[40].mxu1 %v2254_v36 }
 0x211   :  { %857 = vmatprep.mubr.bf16.mxu1 %v2256_v37 }
 0x218   :  { %858 = vmatmul.mubr.bf16.gmra.mrb[44].mxu1 %v2260_v40 }
 0x219   :  { %867 = vmatprep.mubr.bf16.mxu1 %v2262_v41 }
 0x220   :  { %868 = vmatmul.mubr.bf16.gmra.mrb[48].mxu1 %v2266_v44 }
 0x221   :  { %877 = vmatprep.mubr.bf16.mxu1 %v2268_v45 }
 0x228   :  { %878 = vmatmul.mubr.bf16.gmra.mrb[52].mxu1 %v2272_v46 }
 0x229   :  { %887 = vmatprep.mubr.bf16.mxu1 %v2274_v47 }
 0x230   :  { %888 = vmatmul.mubr.bf16.gmra.mrb[56].mxu1 %v2278_v48 }
 0x231   :  { %897 = vmatprep.mubr.bf16.mxu1 %v2280_v49 }
 0x238   :  { %898 = vmatmul.mubr.bf16.gmra.mrb[60].mxu1 %v2284_v50 }
 0x239   :  { %1357 = vmatprep.mubr.bf16.mxu1 %v2202_v15 }
 0x293   :  { %v749_v51 = vpop.f32.mrb[0].mxu1 }
 0x294   :  { %v751_v52 = vpop.f32.mrb[1].mxu1  ;;  %v908_v54 = vmax.f32 %v749_v51, 0.0 }
 0x295   :  { %v753_v53 = vpop.f32.mrb[2].mxu1  ;;  %v909_v57 = vmax.f32 %v751_v52, 0.0 }
 0x296   :  { %v910_v55 = vmax.f32 %v753_v53, 0.0  ;;  %v755_v56 = vpop.f32.mrb[3].mxu1 }
 0x297   :  { %v911_v58 = vmax.f32 %v755_v56, 0.0 }
 0x298   :  { %v972_v59 = vpack.c.bf16 %v910_v55, %v908_v54 }
 0x299   :  { %v973_v60 = vpack.c.bf16 %v911_v58, %v909_v57 }
 0x29b   :  { %v759_v61 = vpop.f32.mrb[4].mxu1  ;;  %1164 = vmatprep.mubr.bf16.mxu0 %v973_v60 }
 0x29c   :  { %v761_v62 = vpop.f32.mrb[5].mxu1  ;;  %1165 = vmatmul.mubr.bf16.vlgmr.msra.gmra.mrb[64].mxu0 %v972_v59  ;;  %v912_v0 = vmax.f32 %v759_v61, 0.0 }
 0x29d   :  { %v763_v63 = vpop.f32.mrb[6].mxu1  ;;  %v913_v3 = vmax.f32 %v761_v62, 0.0 }
 0x29e   :  { %v914_v1 = vmax.f32 %v763_v63, 0.0  ;;  %v765_v2 = vpop.f32.mrb[7].mxu1 }
 0x29f   :  { %v915_v4 = vmax.f32 %v765_v2, 0.0 }
 0x2a0   :  { %v974_v5 = vpack.c.bf16 %v914_v1, %v912_v0 }
 0x2a1   :  { %v975_v6 = vpack.c.bf16 %v915_v4, %v913_v3 }
 0x2a3   :  { %v769_v8 = vpop.f32.mrb[8].mxu1  ;;  %1172 = vmatprep.mubr.bf16.mxu0 %v975_v6 }
 0x2a4   :  { %v771_v10 = vpop.f32.mrb[9].mxu1  ;;  %1173 = vmatmul.mubr.bf16.gmra.mrb[68].mxu0 %v974_v5  ;;  %v916_v12 = vmax.f32 %v769_v8, 0.0 }
 0x2a5   :  { %v773_v11 = vpop.f32.mrb[10].mxu1  ;;  %v917_v16 = vmax.f32 %v771_v10, 0.0 }
 0x2a6   :  { %v918_v14 = vmax.f32 %v773_v11, 0.0  ;;  %v775_v15 = vpop.f32.mrb[11].mxu1 }
 0x2a7   :  { %v919_v17 = vmax.f32 %v775_v15, 0.0 }
 0x2a8   :  { %v976_v18 = vpack.c.bf16 %v918_v14, %v916_v12 }
 0x2a9   :  { %v977_v38 = vpack.c.bf16 %v919_v17, %v917_v16 }
 0x2ab   :  { %v779_v39 = vpop.f32.mrb[12].mxu1  ;;  %1180 = vmatprep.mubr.bf16.mxu0 %v977_v38 }
 0x2ac   :  { %v781_v42 = vpop.f32.mrb[13].mxu1  ;;  %1181 = vmatmul.mubr.bf16.gmra.mrb[72].mxu0 %v976_v18  ;;  %v920_v51 = vmax.f32 %v779_v39, 0.0 }
 0x2ad   :  { %v783_v43 = vpop.f32.mrb[14].mxu1  ;;  %v921_v54 = vmax.f32 %v781_v42, 0.0 }
 0x2ae   :  { %v922_v52 = vmax.f32 %v783_v43, 0.0  ;;  %v785_v53 = vpop.f32.mrb[15].mxu1 }
 0x2af   :  { %v923_v55 = vmax.f32 %v785_v53, 0.0 }
 0x2b0   :  { %v978_v56 = vpack.c.bf16 %v922_v52, %v920_v51 }
 0x2b1   :  { %v979_v57 = vpack.c.bf16 %v923_v55, %v921_v54 }
 0x2b3   :  { %v789_v58 = vpop.f32.mrb[16].mxu1  ;;  %1188 = vmatprep.mubr.bf16.mxu0 %v979_v57 }
 0x2b4   :  { %v791_v59 = vpop.f32.mrb[17].mxu1  ;;  %1189 = vmatmul.mubr.bf16.gmra.mrb[76].mxu0 %v978_v56  ;;  %v924_v61 = vmax.f32 %v789_v58, 0.0 }
 0x2b5   :  { %v793_v60 = vpop.f32.mrb[18].mxu1  ;;  %v925_v0 = vmax.f32 %v791_v59, 0.0 }
 0x2b6   :  { %v926_v62 = vmax.f32 %v793_v60, 0.0  ;;  %v795_v63 = vpop.f32.mrb[19].mxu1 }
 0x2b7   :  { %v927_v1 = vmax.f32 %v795_v63, 0.0 }
 0x2b8   :  { %v980_v2 = vpack.c.bf16 %v926_v62, %v924_v61 }
 0x2b9   :  { %v981_v3 = vpack.c.bf16 %v927_v1, %v925_v0 }
 0x2bb   :  { %v799_v4 = vpop.f32.mrb[20].mxu1  ;;  %1196 = vmatprep.mubr.bf16.mxu0 %v981_v3 }
 0x2bc   :  { %v801_v5 = vpop.f32.mrb[21].mxu1  ;;  %1197 = vmatmul.mubr.bf16.gmra.mrb[80].mxu0 %v980_v2  ;;  %v928_v8 = vmax.f32 %v799_v4, 0.0 }
 0x2bd   :  { %v803_v6 = vpop.f32.mrb[22].mxu1  ;;  %v929_v12 = vmax.f32 %v801_v5, 0.0 }
 0x2be   :  { %v930_v10 = vmax.f32 %v803_v6, 0.0  ;;  %v805_v11 = vpop.f32.mrb[23].mxu1 }
 0x2bf   :  { %v931_v14 = vmax.f32 %v805_v11, 0.0 }
 0x2c0   :  { %v982_v15 = vpack.c.bf16 %v930_v10, %v928_v8 }
 0x2c1   :  { %v983_v16 = vpack.c.bf16 %v931_v14, %v929_v12 }
 0x2c3   :  { %v809_v17 = vpop.f32.mrb[24].mxu1  ;;  %1204 = vmatprep.mubr.bf16.mxu0 %v983_v16 }
 0x2c4   :  { %v811_v18 = vpop.f32.mrb[25].mxu1  ;;  %1205 = vmatmul.mubr.bf16.gmra.mrb[84].mxu0 %v982_v15  ;;  %v932_v39 = vmax.f32 %v809_v17, 0.0 }
 0x2c5   :  { %v813_v38 = vpop.f32.mrb[26].mxu1  ;;  %v933_v51 = vmax.f32 %v811_v18, 0.0 }
 0x2c6   :  { %v934_v42 = vmax.f32 %v813_v38, 0.0  ;;  %v815_v43 = vpop.f32.mrb[27].mxu1 }
 0x2c7   :  { %v935_v52 = vmax.f32 %v815_v43, 0.0 }
 0x2c8   :  { %v984_v53 = vpack.c.bf16 %v934_v42, %v932_v39 }
 0x2c9   :  { %v985_v54 = vpack.c.bf16 %v935_v52, %v933_v51 }
 0x2cb   :  { %v819_v55 = vpop.f32.mrb[28].mxu1  ;;  %1212 = vmatprep.mubr.bf16.mxu0 %v985_v54 }
 0x2cc   :  { %v821_v56 = vpop.f32.mrb[29].mxu1  ;;  %1213 = vmatmul.mubr.bf16.gmra.mrb[88].mxu0 %v984_v53  ;;  %v936_v58 = vmax.f32 %v819_v55, 0.0 }
 0x2cd   :  { %v823_v57 = vpop.f32.mrb[30].mxu1  ;;  %v937_v61 = vmax.f32 %v821_v56, 0.0 }
 0x2ce   :  { %v938_v59 = vmax.f32 %v823_v57, 0.0  ;;  %v825_v60 = vpop.f32.mrb[31].mxu1 }
 0x2cf   :  { %v939_v62 = vmax.f32 %v825_v60, 0.0 }
 0x2d0   :  { %v986_v63 = vpack.c.bf16 %v938_v59, %v936_v58 }
 0x2d1   :  { %v987_v0 = vpack.c.bf16 %v939_v62, %v937_v61 }
 0x2d3   :  { %v829_v1 = vpop.f32.mrb[32].mxu1  ;;  %1220 = vmatprep.mubr.bf16.mxu0 %v987_v0 }
 0x2d4   :  { %v831_v2 = vpop.f32.mrb[33].mxu1  ;;  %1221 = vmatmul.mubr.bf16.gmra.mrb[92].mxu0 %v986_v63  ;;  %v940_v4 = vmax.f32 %v829_v1, 0.0 }
 0x2d5   :  { %v833_v3 = vpop.f32.mrb[34].mxu1  ;;  %v941_v8 = vmax.f32 %v831_v2, 0.0 }
 0x2d6   :  { %v942_v5 = vmax.f32 %v833_v3, 0.0  ;;  %v835_v6 = vpop.f32.mrb[35].mxu1 }
 0x2d7   :  { %v943_v10 = vmax.f32 %v835_v6, 0.0 }
 0x2d8   :  { %v988_v11 = vpack.c.bf16 %v942_v5, %v940_v4 }
 0x2d9   :  { %v989_v12 = vpack.c.bf16 %v943_v10, %v941_v8 }
 0x2db   :  { %v839_v14 = vpop.f32.mrb[36].mxu1  ;;  %1228 = vmatprep.mubr.bf16.mxu0 %v989_v12 }
 0x2dc   :  { %v841_v15 = vpop.f32.mrb[37].mxu1  ;;  %1229 = vmatmul.mubr.bf16.gmra.mrb[96].mxu0 %v988_v11  ;;  %v944_v17 = vmax.f32 %v839_v14, 0.0 }
 0x2dd   :  { %v843_v16 = vpop.f32.mrb[38].mxu1  ;;  %v945_v39 = vmax.f32 %v841_v15, 0.0 }
 0x2de   :  { %v946_v18 = vmax.f32 %v843_v16, 0.0  ;;  %v845_v38 = vpop.f32.mrb[39].mxu1 }
 0x2df   :  { %v947_v42 = vmax.f32 %v845_v38, 0.0 }
 0x2e0   :  { %v990_v43 = vpack.c.bf16 %v946_v18, %v944_v17 }
 0x2e1   :  { %v991_v51 = vpack.c.bf16 %v947_v42, %v945_v39 }
 0x2e3   :  { %v849_v52 = vpop.f32.mrb[40].mxu1  ;;  %1236 = vmatprep.mubr.bf16.mxu0 %v991_v51 }
 0x2e4   :  { %v851_v53 = vpop.f32.mrb[41].mxu1  ;;  %1237 = vmatmul.mubr.bf16.gmra.mrb[100].mxu0 %v990_v43  ;;  %v948_v55 = vmax.f32 %v849_v52, 0.0 }
 0x2e5   :  { %v853_v54 = vpop.f32.mrb[42].mxu1  ;;  %v949_v58 = vmax.f32 %v851_v53, 0.0 }
 0x2e6   :  { %v950_v56 = vmax.f32 %v853_v54, 0.0  ;;  %v855_v57 = vpop.f32.mrb[43].mxu1 }
 0x2e7   :  { %v951_v59 = vmax.f32 %v855_v57, 0.0 }
 0x2e8   :  { %v992_v60 = vpack.c.bf16 %v950_v56, %v948_v55 }
 0x2e9   :  { %v993_v61 = vpack.c.bf16 %v951_v59, %v949_v58 }
 0x2eb   :  { %v859_v62 = vpop.f32.mrb[44].mxu1  ;;  %1244 = vmatprep.mubr.bf16.mxu0 %v993_v61 }
 0x2ec   :  { %v861_v63 = vpop.f32.mrb[45].mxu1  ;;  %1245 = vmatmul.mubr.bf16.gmra.mrb[104].mxu0 %v992_v60  ;;  %v952_v1 = vmax.f32 %v859_v62, 0.0 }
 0x2ed   :  { %v863_v0 = vpop.f32.mrb[46].mxu1  ;;  %v953_v4 = vmax.f32 %v861_v63, 0.0 }
 0x2ee   :  { %v954_v2 = vmax.f32 %v863_v0, 0.0  ;;  %v865_v3 = vpop.f32.mrb[47].mxu1 }
 0x2ef   :  { %v955_v5 = vmax.f32 %v865_v3, 0.0 }
 0x2f0   :  { %v994_v6 = vpack.c.bf16 %v954_v2, %v952_v1 }
 0x2f1   :  { %v995_v8 = vpack.c.bf16 %v955_v5, %v953_v4 }
 0x2f3   :  { %v869_v10 = vpop.f32.mrb[48].mxu1  ;;  %1252 = vmatprep.mubr.bf16.mxu0 %v995_v8 }
 0x2f4   :  { %v871_v11 = vpop.f32.mrb[49].mxu1  ;;  %1253 = vmatmul.mubr.bf16.gmra.mrb[108].mxu0 %v994_v6  ;;  %v956_v14 = vmax.f32 %v869_v10, 0.0 }
 0x2f5   :  { %v873_v12 = vpop.f32.mrb[50].mxu1  ;;  %v957_v17 = vmax.f32 %v871_v11, 0.0 }
 0x2f6   :  { %v958_v15 = vmax.f32 %v873_v12, 0.0  ;;  %v875_v16 = vpop.f32.mrb[51].mxu1 }
 0x2f7   :  { %v959_v18 = vmax.f32 %v875_v16, 0.0 }
 0x2f8   :  { %v996_v38 = vpack.c.bf16 %v958_v15, %v956_v14 }
 0x2f9   :  { %v997_v39 = vpack.c.bf16 %v959_v18, %v957_v17 }
 0x2fb   :  { %v879_v42 = vpop.f32.mrb[52].mxu1  ;;  %1260 = vmatprep.mubr.bf16.mxu0 %v997_v39 }
 0x2fc   :  { %v881_v43 = vpop.f32.mrb[53].mxu1  ;;  %1261 = vmatmul.mubr.bf16.gmra.mrb[112].mxu0 %v996_v38  ;;  %v960_v52 = vmax.f32 %v879_v42, 0.0 }
 0x2fd   :  { %v883_v51 = vpop.f32.mrb[54].mxu1  ;;  %v961_v55 = vmax.f32 %v881_v43, 0.0 }
 0x2fe   :  { %v962_v53 = vmax.f32 %v883_v51, 0.0  ;;  %v885_v54 = vpop.f32.mrb[55].mxu1 }
 0x2ff   :  { %v963_v56 = vmax.f32 %v885_v54, 0.0 }
 0x300   :  { %v998_v57 = vpack.c.bf16 %v962_v53, %v960_v52 }
 0x301   :  { %v999_v58 = vpack.c.bf16 %v963_v56, %v961_v55 }
 0x303   :  { %v889_v59 = vpop.f32.mrb[56].mxu1  ;;  %1268 = vmatprep.mubr.bf16.mxu0 %v999_v58 }
 0x304   :  { %v891_v60 = vpop.f32.mrb[57].mxu1  ;;  %1269 = vmatmul.mubr.bf16.gmra.mrb[116].mxu0 %v998_v57  ;;  %v964_v62 = vmax.f32 %v889_v59, 0.0 }
 0x305   :  { %v893_v61 = vpop.f32.mrb[58].mxu1  ;;  %v965_v1 = vmax.f32 %v891_v60, 0.0 }
 0x306   :  { %v966_v63 = vmax.f32 %v893_v61, 0.0  ;;  %v895_v0 = vpop.f32.mrb[59].mxu1 }
 0x307   :  { %v967_v2 = vmax.f32 %v895_v0, 0.0 }
 0x308   :  { %v1000_v3 = vpack.c.bf16 %v966_v63, %v964_v62 }
 0x309   :  { %v1001_v4 = vpack.c.bf16 %v967_v2, %v965_v1 }
 0x30b   :  { %v899_v5 = vpop.f32.mrb[60].mxu1  ;;  %1276 = vmatprep.mubr.bf16.mxu0 %v1001_v4 }
 0x30c   :  { %v901_v6 = vpop.f32.mrb[61].mxu1  ;;  %1277 = vmatmul.mubr.bf16.gmra.mrb[120].mxu0 %v1000_v3  ;;  %v968_v10 = vmax.f32 %v899_v5, 0.0 }
 0x30d   :  { %v903_v8 = vpop.f32.mrb[62].mxu1  ;;  %v969_v14 = vmax.f32 %v901_v6, 0.0 }
 0x30e   :  { %v970_v11 = vmax.f32 %v903_v8, 0.0  ;;  %v905_v12 = vpop.f32.mrb[63].mxu1 }
 0x30f   :  { %v971_v15 = vmax.f32 %v905_v12, 0.0 }
 0x310   :  { %v1002_v16 = vpack.c.bf16 %v970_v11, %v968_v10 }
 0x311   :  { %v1003_v17 = vpack.c.bf16 %v971_v15, %v969_v14 }
 0x313   :  { %1284 = vmatprep.mubr.bf16.mxu0 %v1003_v17 }
 0x314   :  { %1285 = vmatmul.mubr.bf16.gmra.mrb[124].mxu0 %v1002_v16 }
 0x315   :  { %1341 = vmatprep.mubr.bf16.mxu0 %v2191_v33 }
 0x36f   :  { %v1617_v18 = vpop.f32.mrb[64].mxu0 }
 0x370   :  { %v1618_v38 = vpop.f32.mrb[65].mxu0 }
 0x371   :  { %v1619_v39 = vadd.f32 %v1618_v38, %v1617_v18  ;;  %v1620_v42 = vpop.f32.mrb[66].mxu0 }
 0x372   :  { %v1621_v43 = vpop.f32.mrb[67].mxu0 }
 0x373   :  { %v1622_v51 = vadd.f32 %v1621_v43, %v1620_v42 }
 0x375   :  { %v1293_v52 = vpack.c.bf16 %v1622_v51, %v1619_v39 }
 0x377   :  { %v1623_v53 = vpop.f32.mrb[68].mxu0 }
 0x378   :  { %v1624_v54 = vpop.f32.mrb[69].mxu0 }
 0x379   :  { %v1625_v55 = vadd.f32 %v1624_v54, %v1623_v53  ;;  %v1626_v56 = vpop.f32.mrb[70].mxu0 }
 0x37a   :  { %v1627_v57 = vpop.f32.mrb[71].mxu0 }
 0x37b   :  { %v1628_v58 = vadd.f32 %v1627_v57, %v1626_v56 }
 0x37d   :  { %v2289_v59 = vpack.c.bf16 %v1628_v58, %v1625_v55 }
 0x37f   :  { %v1629_v60 = vpop.f32.mrb[72].mxu0 }
 0x380   :  { %v1630_v61 = vpop.f32.mrb[73].mxu0 }
 0x381   :  { %v1631_v62 = vadd.f32 %v1630_v61, %v1629_v60  ;;  %v1632_v63 = vpop.f32.mrb[74].mxu0 }
 0x382   :  { %v1633_v33 = vpop.f32.mrb[75].mxu0 }
 0x383   :  { %v1634_v0 = vadd.f32 %v1633_v33, %v1632_v63 }
 0x385   :  { %v2291_v1 = vpack.c.bf16 %v1634_v0, %v1631_v62 }
 0x387   :  { %v1635_v2 = vpop.f32.mrb[76].mxu0 }
 0x388   :  { %v1636_v3 = vpop.f32.mrb[77].mxu0 }
 0x389   :  { %v1637_v4 = vadd.f32 %v1636_v3, %v1635_v2  ;;  %v1638_v5 = vpop.f32.mrb[78].mxu0 }
 0x38a   :  { %v1639_v6 = vpop.f32.mrb[79].mxu0 }
 0x38b   :  { %v1640_v8 = vadd.f32 %v1639_v6, %v1638_v5 }
 0x38d   :  { %v2293_v10 = vpack.c.bf16 %v1640_v8, %v1637_v4 }
 0x38f   :  { %v1641_v11 = vpop.f32.mrb[80].mxu0 }
 0x390   :  { %v1642_v12 = vpop.f32.mrb[81].mxu0 }
 0x391   :  { %v1643_v14 = vadd.f32 %v1642_v12, %v1641_v11  ;;  %v1644_v15 = vpop.f32.mrb[82].mxu0 }
 0x392   :  { %v1645_v16 = vpop.f32.mrb[83].mxu0 }
 0x393   :  { %v1646_v17 = vadd.f32 %v1645_v16, %v1644_v15 }
 0x395   :  { %v2295_v18 = vpack.c.bf16 %v1646_v17, %v1643_v14 }
 0x397   :  { %v1647_v38 = vpop.f32.mrb[84].mxu0 }
 0x398   :  { %v1648_v39 = vpop.f32.mrb[85].mxu0 }
 0x399   :  { %v1649_v42 = vadd.f32 %v1648_v39, %v1647_v38  ;;  %v1650_v43 = vpop.f32.mrb[86].mxu0 }
 0x39a   :  { %v1651_v51 = vpop.f32.mrb[87].mxu0 }
 0x39b   :  { %v1652_v53 = vadd.f32 %v1651_v51, %v1650_v43 }
 0x39d   :  { %v2297_v54 = vpack.c.bf16 %v1652_v53, %v1649_v42 }
 0x39f   :  { %v1653_v55 = vpop.f32.mrb[88].mxu0 }
 0x3a0   :  { %v1654_v56 = vpop.f32.mrb[89].mxu0 }
 0x3a1   :  { %v1655_v57 = vadd.f32 %v1654_v56, %v1653_v55  ;;  %v1656_v58 = vpop.f32.mrb[90].mxu0 }
 0x3a2   :  { %v1657_v60 = vpop.f32.mrb[91].mxu0 }
 0x3a3   :  { %v1658_v61 = vadd.f32 %v1657_v60, %v1656_v58 }
 0x3a5   :  { %v2299_v62 = vpack.c.bf16 %v1658_v61, %v1655_v57 }
 0x3a7   :  { %v1659_v63 = vpop.f32.mrb[92].mxu0 }
 0x3a8   :  { %v1660_v33 = vpop.f32.mrb[93].mxu0 }
 0x3a9   :  { %v1661_v0 = vadd.f32 %v1660_v33, %v1659_v63  ;;  %v1662_v2 = vpop.f32.mrb[94].mxu0 }
 0x3aa   :  { %v1663_v3 = vpop.f32.mrb[95].mxu0 }
 0x3ab   :  { %v1664_v4 = vadd.f32 %v1663_v3, %v1662_v2 }
 0x3ad   :  { %v2301_v5 = vpack.c.bf16 %v1664_v4, %v1661_v0 }
 0x3af   :  { %v1665_v6 = vpop.f32.mrb[96].mxu0 }
 0x3b0   :  { %v1666_v8 = vpop.f32.mrb[97].mxu0 }
 0x3b1   :  { %v1667_v11 = vadd.f32 %v1666_v8, %v1665_v6  ;;  %v1668_v12 = vpop.f32.mrb[98].mxu0 }
 0x3b2   :  { %v1669_v14 = vpop.f32.mrb[99].mxu0 }
 0x3b3   :  { %v1670_v15 = vadd.f32 %v1669_v14, %v1668_v12 }
 0x3b5   :  { %v1301_v16 = vpack.c.bf16 %v1670_v15, %v1667_v11 }
 0x3b7   :  { %v1671_v17 = vpop.f32.mrb[100].mxu0  ;;  %1713 = vmatprep.subr.bf16.mxu0 %v1301_v16  ;;  %1825 = vmatprep.subr.bf16.mxu1 %v1301_v16 }
 0x3b8   :  { %v1672_v38 = vpop.f32.mrb[101].mxu0  ;;  %1714 = vmatpush3.bf16.msra.mxu0 %v1293_v52  ;;  %1833 = vmatpush3.bf16.msra.mxu1 %v1293_v52 }
 0x3b9   :  { %v1673_v39 = vadd.f32 %v1672_v38, %v1671_v17  ;;  %v1674_v42 = vpop.f32.mrb[102].mxu0 }
 0x3ba   :  { %v1675_v43 = vpop.f32.mrb[103].mxu0 }
 0x3bb   :  { %v1676_v51 = vadd.f32 %v1675_v43, %v1674_v42 }
 0x3bd   :  { %v1302_v53 = vpack.c.bf16 %v1676_v51, %v1673_v39 }
 0x3bf   :  { %v1677_v55 = vpop.f32.mrb[104].mxu0  ;;  %1715 = vmatprep.subr.bf16.mxu0 %v1302_v53  ;;  %1826 = vmatprep.subr.bf16.mxu1 %v1302_v53 }
 0x3c0   :  { %v1678_v56 = vpop.f32.mrb[105].mxu0  ;;  %1716 = vmatpush3.bf16.msra.mxu0 %v2289_v59  ;;  %1834 = vmatpush3.bf16.msra.mxu1 %v2289_v59 }
 0x3c1   :  { %v1679_v57 = vadd.f32 %v1678_v56, %v1677_v55  ;;  %v1680_v58 = vpop.f32.mrb[106].mxu0 }
 0x3c2   :  { %v1681_v60 = vpop.f32.mrb[107].mxu0 }
 0x3c3   :  { %v1682_v61 = vadd.f32 %v1681_v60, %v1680_v58 }
 0x3c5   :  { %v1303_v63 = vpack.c.bf16 %v1682_v61, %v1679_v57 }
 0x3c7   :  { %v1683_v33 = vpop.f32.mrb[108].mxu0  ;;  %1717 = vmatprep.subr.bf16.mxu0 %v1303_v63  ;;  %1827 = vmatprep.subr.bf16.mxu1 %v1303_v63 }
 0x3c8   :  { %v1684_v52 = vpop.f32.mrb[109].mxu0  ;;  %1718 = vmatpush3.bf16.msra.mxu0 %v2291_v1  ;;  %1835 = vmatpush3.bf16.msra.mxu1 %v2291_v1 }
 0x3c9   :  { %v1685_v0 = vadd.f32 %v1684_v52, %v1683_v33  ;;  %v1686_v2 = vpop.f32.mrb[110].mxu0 }
 0x3ca   :  { %v1687_v3 = vpop.f32.mrb[111].mxu0 }
 0x3cb   :  { %v1688_v4 = vadd.f32 %v1687_v3, %v1686_v2 }
 0x3cd   :  { %v1304_v6 = vpack.c.bf16 %v1688_v4, %v1685_v0 }
 0x3cf   :  { %v1689_v8 = vpop.f32.mrb[112].mxu0  ;;  %1719 = vmatprep.subr.bf16.mxu0 %v1304_v6  ;;  %1828 = vmatprep.subr.bf16.mxu1 %v1304_v6 }
 0x3d0   :  { %v1690_v59 = vpop.f32.mrb[113].mxu0  ;;  %1720 = vmatpush3.bf16.msra.mxu0 %v2293_v10  ;;  %1836 = vmatpush3.bf16.msra.mxu1 %v2293_v10 }
 0x3d1   :  { %v1691_v11 = vadd.f32 %v1690_v59, %v1689_v8  ;;  %v1692_v12 = vpop.f32.mrb[114].mxu0 }
 0x3d2   :  { %v1693_v14 = vpop.f32.mrb[115].mxu0 }
 0x3d3   :  { %v1694_v15 = vadd.f32 %v1693_v14, %v1692_v12 }
 0x3d5   :  { %v1305_v16 = vpack.c.bf16 %v1694_v15, %v1691_v11 }
 0x3d7   :  { %v1695_v17 = vpop.f32.mrb[116].mxu0  ;;  %1721 = vmatprep.subr.bf16.mxu0 %v1305_v16  ;;  %1829 = vmatprep.subr.bf16.mxu1 %v1305_v16 }
 0x3d8   :  { %v1696_v1 = vpop.f32.mrb[117].mxu0  ;;  %1722 = vmatpush3.bf16.msra.mxu0 %v2295_v18  ;;  %1837 = vmatpush3.bf16.msra.mxu1 %v2295_v18 }
 0x3d9   :  { %v1697_v38 = vadd.f32 %v1696_v1, %v1695_v17  ;;  %v1698_v39 = vpop.f32.mrb[118].mxu0 }
 0x3da   :  { %v1699_v42 = vpop.f32.mrb[119].mxu0 }
 0x3db   :  { %v1700_v43 = vadd.f32 %v1699_v42, %v1698_v39 }
 0x3dd   :  { %v1306_v51 = vpack.c.bf16 %v1700_v43, %v1697_v38 }
 0x3df   :  { %v1701_v53 = vpop.f32.mrb[120].mxu0  ;;  %1723 = vmatprep.subr.bf16.mxu0 %v1306_v51  ;;  %1830 = vmatprep.subr.bf16.mxu1 %v1306_v51 }
 0x3e0   :  { %v1702_v10 = vpop.f32.mrb[121].mxu0  ;;  %1724 = vmatpush3.bf16.msra.mxu0 %v2297_v54  ;;  %1838 = vmatpush3.bf16.msra.mxu1 %v2297_v54 }
 0x3e1   :  { %v1703_v55 = vadd.f32 %v1702_v10, %v1701_v53  ;;  %v1704_v56 = vpop.f32.mrb[122].mxu0 }
 0x3e2   :  { %v1705_v57 = vpop.f32.mrb[123].mxu0 }
 0x3e3   :  { %v1706_v58 = vadd.f32 %v1705_v57, %v1704_v56 }
 0x3e5   :  { %v1307_v60 = vpack.c.bf16 %v1706_v58, %v1703_v55 }
 0x3e7   :  { %v1707_v61 = vpop.f32.mrb[124].mxu0  ;;  %1725 = vmatprep.subr.bf16.mxu0 %v1307_v60  ;;  %1831 = vmatprep.subr.bf16.mxu1 %v1307_v60 }
 0x3e8   :  { %v1708_v18 = vpop.f32.mrb[125].mxu0  ;;  %1726 = vmatpush3.bf16.msra.mxu0 %v2299_v62  ;;  %1839 = vmatpush3.bf16.msra.mxu1 %v2299_v62 }
 0x3e9   :  { %v1709_v63 = vadd.f32 %v1708_v18, %v1707_v61  ;;  %v1710_v33 = vpop.f32.mrb[126].mxu0 }
 0x3ea   :  { %v1711_v52 = vpop.f32.mrb[127].mxu0 }
 0x3eb   :  { %v1712_v0 = vadd.f32 %v1711_v52, %v1710_v33 }
 0x3ed   :  { %v1308_v2 = vpack.c.bf16 %v1712_v0, %v1709_v63 }
 0x3ef   :  { %1727 = vmatprep.subr.bf16.mxu0 %v1308_v2  ;;  %1832 = vmatprep.subr.bf16.mxu1 %v1308_v2 }
 0x3f0   :  { %1728 = vmatpush3.bf16.msra.mxu0 %v2301_v5  ;;  %1840 = vmatpush3.bf16.msra.mxu1 %v2301_v5 }
 0x3f3   :  { %1358 = vmatmul.mubr.bf16.vlgmr.msra.gmra.mrb[64].mxu1 %v2206_v19  ;;  %1342 = vmatmul.mubr.bf16.vlgmr.msra.gmra.mrb[128].mxu0 %v2194_v7 }
 0x3f4   :  { %1365 = vmatprep.mubr.bf16.mxu1 %v2208_v20  ;;  %1349 = vmatprep.mubr.bf16.mxu0 %v2196_v9 }
 0x3fb   :  { %1366 = vmatmul.mubr.bf16.gmra.mrb[68].mxu1 %v2212_v21  ;;  %1350 = vmatmul.mubr.bf16.gmra.mrb[132].mxu0 %v2200_v13 }
 0x3fc   :  { %1373 = vmatprep.mubr.bf16.mxu1 %v2214_v22 }
 0x403   :  { %1374 = vmatmul.mubr.bf16.gmra.mrb[72].mxu1 %v2218_v23 }
 0x404   :  { %1381 = vmatprep.mubr.bf16.mxu1 %v2220_v24 }
 0x40b   :  { %1382 = vmatmul.mubr.bf16.gmra.mrb[76].mxu1 %v2224_v25 }
 0x40c   :  { %1389 = vmatprep.mubr.bf16.mxu1 %v2226_v26 }
 0x413   :  { %1390 = vmatmul.mubr.bf16.gmra.mrb[80].mxu1 %v2230_v27 }
 0x414   :  { %1397 = vmatprep.mubr.bf16.mxu1 %v2232_v28 }
 0x41b   :  { %1398 = vmatmul.mubr.bf16.gmra.mrb[84].mxu1 %v2236_v29 }
 0x41c   :  { %1405 = vmatprep.mubr.bf16.mxu1 %v2238_v30 }
 0x423   :  { %1406 = vmatmul.mubr.bf16.gmra.mrb[88].mxu1 %v2242_v31 }
 0x424   :  { %1413 = vmatprep.mubr.bf16.mxu1 %v2244_v32 }
 0x42b   :  { %1414 = vmatmul.mubr.bf16.gmra.mrb[92].mxu1 %v2248_v34 }
 0x42c   :  { %1421 = vmatprep.mubr.bf16.mxu1 %v2250_v35 }
 0x433   :  { %1422 = vmatmul.mubr.bf16.gmra.mrb[96].mxu1 %v2254_v36 }
 0x434   :  { %1429 = vmatprep.mubr.bf16.mxu1 %v2256_v37 }
 0x43b   :  { %1430 = vmatmul.mubr.bf16.gmra.mrb[100].mxu1 %v2260_v40 }
 0x43c   :  { %1437 = vmatprep.mubr.bf16.mxu1 %v2262_v41 }
 0x443   :  { %1438 = vmatmul.mubr.bf16.gmra.mrb[104].mxu1 %v2266_v44 }
 0x444   :  { %1445 = vmatprep.mubr.bf16.mxu1 %v2268_v45 }
 0x44b   :  { %1446 = vmatmul.mubr.bf16.gmra.mrb[108].mxu1 %v2272_v46 }
 0x44c   :  { %1453 = vmatprep.mubr.bf16.mxu1 %v2274_v47 }
 0x453   :  { %1454 = vmatmul.mubr.bf16.gmra.mrb[112].mxu1 %v2278_v48 }
 0x454   :  { %1461 = vmatprep.mubr.bf16.mxu1 %v2280_v49 }
 0x45b   :  { %1462 = vmatmul.mubr.bf16.gmra.mrb[116].mxu1 %v2284_v50 }
 0x4c6   :  { %v1741_v7 = vpop.f32.mrb[64].mxu1  ;;  %v1729_v9 = vpop.f32.mrb[128].mxu0 }
 0x4c7   :  { %v1742_v13 = vpop.f32.mrb[65].mxu1  ;;  %v1730_v19 = vpop.f32.mrb[129].mxu0 }
 0x4c8   :  { %v1743_v20 = vadd.f32 %v1742_v13, %v1741_v7  ;;  %v1744_v21 = vpop.f32.mrb[66].mxu1  ;;  %v1731_v22 = vadd.f32 %v1730_v19, %v1729_v9  ;;  %v1732_v23 = vpop.f32.mrb[130].mxu0 }
 0x4c9   :  { %v1745_v24 = vpop.f32.mrb[67].mxu1  ;;  %v1733_v25 = vpop.f32.mrb[131].mxu0 }
 0x4ca   :  { %1474 = vst [vmem:[#allocation10 + $0x20] sm:$0xff] %v1743_v20  ;;  %v1746_v26 = vadd.f32 %v1745_v24, %v1744_v21  ;;  %1470 = vst [vmem:[#allocation10] sm:$0xff] %v1731_v22  ;;  %v1734_v27 = vadd.f32 %v1733_v25, %v1732_v23 }
 0x4cc   :  { %1475 = vst [vmem:[#allocation10 + $0x28] sm:$0xff] %v1746_v26  ;;  %1471 = vst [vmem:[#allocation10 + $0x8] sm:$0xff] %v1734_v27 }
 0x4ce   :  { %v1747_v28 = vpop.f32.mrb[68].mxu1  ;;  %v1735_v29 = vpop.f32.mrb[132].mxu0 }
 0x4cf   :  { %v1748_v30 = vpop.f32.mrb[69].mxu1  ;;  %v1736_v31 = vpop.f32.mrb[133].mxu0 }
 0x4d0   :  { %v1749_v32 = vadd.f32 %v1748_v30, %v1747_v28  ;;  %v1750_v34 = vpop.f32.mrb[70].mxu1  ;;  %v1737_v35 = vadd.f32 %v1736_v31, %v1735_v29  ;;  %v1738_v36 = vpop.f32.mrb[134].mxu0 }
 0x4d1   :  { %v1751_v37 = vpop.f32.mrb[71].mxu1  ;;  %v1739_v40 = vpop.f32.mrb[135].mxu0 }
 0x4d2   :  { %1476 = vst [vmem:[#allocation10 + $0x30] sm:$0xff] %v1749_v32  ;;  %v1752_v41 = vadd.f32 %v1751_v37, %v1750_v34  ;;  %1472 = vst [vmem:[#allocation10 + $0x10] sm:$0xff] %v1737_v35  ;;  %v1740_v44 = vadd.f32 %v1739_v40, %v1738_v36 }
 0x4d4   :  { %1477 = vst [vmem:[#allocation10 + $0x38] sm:$0xff] %v1752_v41  ;;  %1473 = vst [vmem:[#allocation10 + $0x18] sm:$0xff] %v1740_v44 }
 0x4d6   :  { %v1753_v45 = vpop.f32.mrb[72].mxu1 }
 0x4d7   :  { %v1754_v46 = vpop.f32.mrb[73].mxu1 }
 0x4d8   :  { %v1755_v47 = vadd.f32 %v1754_v46, %v1753_v45  ;;  %v1756_v48 = vpop.f32.mrb[74].mxu1 }
 0x4d9   :  { %v1757_v49 = vpop.f32.mrb[75].mxu1 }
 0x4da   :  { %1478 = vst [vmem:[#allocation10 + $0x40] sm:$0xff] %v1755_v47  ;;  %v1758_v50 = vadd.f32 %v1757_v49, %v1756_v48 }
 0x4dc   :  { %1479 = vst [vmem:[#allocation10 + $0x48] sm:$0xff] %v1758_v50 }
 0x4de   :  { %v1759_v54 = vpop.f32.mrb[76].mxu1 }
 0x4df   :  { %v1760_v62 = vpop.f32.mrb[77].mxu1 }
 0x4e0   :  { %v1761_v5 = vadd.f32 %v1760_v62, %v1759_v54  ;;  %v1762_v3 = vpop.f32.mrb[78].mxu1 }
 0x4e1   :  { %v1763_v4 = vpop.f32.mrb[79].mxu1 }
 0x4e2   :  { %1480 = vst [vmem:[#allocation10 + $0x50] sm:$0xff] %v1761_v5  ;;  %v1764_v6 = vadd.f32 %v1763_v4, %v1762_v3 }
 0x4e4   :  { %1481 = vst [vmem:[#allocation10 + $0x58] sm:$0xff] %v1764_v6 }
 0x4e6   :  { %v1765_v8 = vpop.f32.mrb[80].mxu1 }
 0x4e7   :  { %v1766_v59 = vpop.f32.mrb[81].mxu1 }
 0x4e8   :  { %v1767_v11 = vadd.f32 %v1766_v59, %v1765_v8  ;;  %v1768_v12 = vpop.f32.mrb[82].mxu1 }
 0x4e9   :  { %v1769_v14 = vpop.f32.mrb[83].mxu1 }
 0x4ea   :  { %1482 = vst [vmem:[#allocation10 + $0x60] sm:$0xff] %v1767_v11  ;;  %v1770_v15 = vadd.f32 %v1769_v14, %v1768_v12 }
 0x4ec   :  { %1483 = vst [vmem:[#allocation10 + $0x68] sm:$0xff] %v1770_v15 }
 0x4ee   :  { %v1771_v16 = vpop.f32.mrb[84].mxu1 }
 0x4ef   :  { %v1772_v17 = vpop.f32.mrb[85].mxu1 }
 0x4f0   :  { %v1773_v1 = vadd.f32 %v1772_v17, %v1771_v16  ;;  %v1774_v38 = vpop.f32.mrb[86].mxu1 }
 0x4f1   :  { %v1775_v39 = vpop.f32.mrb[87].mxu1 }
 0x4f2   :  { %1484 = vst [vmem:[#allocation10 + $0x70] sm:$0xff] %v1773_v1  ;;  %v1776_v42 = vadd.f32 %v1775_v39, %v1774_v38 }
 0x4f4   :  { %1485 = vst [vmem:[#allocation10 + $0x78] sm:$0xff] %v1776_v42 }
 0x4f6   :  { %v1777_v43 = vpop.f32.mrb[88].mxu1 }
 0x4f7   :  { %v1778_v51 = vpop.f32.mrb[89].mxu1 }
 0x4f8   :  { %v1779_v53 = vadd.f32 %v1778_v51, %v1777_v43  ;;  %v1780_v10 = vpop.f32.mrb[90].mxu1 }
 0x4f9   :  { %v1781_v55 = vpop.f32.mrb[91].mxu1 }
 0x4fa   :  { %1486 = vst [vmem:[#allocation10 + $0x80] sm:$0xff] %v1779_v53  ;;  %v1782_v56 = vadd.f32 %v1781_v55, %v1780_v10 }
 0x4fc   :  { %1487 = vst [vmem:[#allocation10 + $0x88] sm:$0xff] %v1782_v56 }
 0x4fe   :  { %v1783_v57 = vpop.f32.mrb[92].mxu1 }
 0x4ff   :  { %v1784_v58 = vpop.f32.mrb[93].mxu1 }
 0x500   :  { %v1785_v60 = vadd.f32 %v1784_v58, %v1783_v57  ;;  %v1786_v61 = vpop.f32.mrb[94].mxu1 }
 0x501   :  { %v1787_v18 = vpop.f32.mrb[95].mxu1 }
 0x502   :  { %1488 = vst [vmem:[#allocation10 + $0x90] sm:$0xff] %v1785_v60  ;;  %v1788_v63 = vadd.f32 %v1787_v18, %v1786_v61 }
 0x504   :  { %1489 = vst [vmem:[#allocation10 + $0x98] sm:$0xff] %v1788_v63 }
 0x506   :  { %v1789_v33 = vpop.f32.mrb[96].mxu1 }
 0x507   :  { %v1790_v52 = vpop.f32.mrb[97].mxu1 }
 0x508   :  { %v1791_v0 = vadd.f32 %v1790_v52, %v1789_v33  ;;  %v1792_v2 = vpop.f32.mrb[98].mxu1 }
 0x509   :  { %v1793_v7 = vpop.f32.mrb[99].mxu1 }
 0x50a   :  { %1490 = vst [vmem:[#allocation10 + $0xa0] sm:$0xff] %v1791_v0  ;;  %v1794_v9 = vadd.f32 %v1793_v7, %v1792_v2 }
 0x50c   :  { %1491 = vst [vmem:[#allocation10 + $0xa8] sm:$0xff] %v1794_v9 }
 0x50e   :  { %v1795_v13 = vpop.f32.mrb[100].mxu1 }
 0x50f   :  { %v1796_v19 = vpop.f32.mrb[101].mxu1 }
 0x510   :  { %v1797_v20 = vadd.f32 %v1796_v19, %v1795_v13  ;;  %v1798_v21 = vpop.f32.mrb[102].mxu1 }
 0x511   :  { %v1799_v22 = vpop.f32.mrb[103].mxu1 }
 0x512   :  { %1492 = vst [vmem:[#allocation10 + $0xb0] sm:$0xff] %v1797_v20  ;;  %v1800_v23 = vadd.f32 %v1799_v22, %v1798_v21 }
 0x514   :  { %1493 = vst [vmem:[#allocation10 + $0xb8] sm:$0xff] %v1800_v23 }
 0x516   :  { %v1801_v24 = vpop.f32.mrb[104].mxu1 }
 0x517   :  { %v1802_v25 = vpop.f32.mrb[105].mxu1 }
 0x518   :  { %v1803_v26 = vadd.f32 %v1802_v25, %v1801_v24  ;;  %v1804_v27 = vpop.f32.mrb[106].mxu1 }
 0x519   :  { %v1805_v28 = vpop.f32.mrb[107].mxu1 }
 0x51a   :  { %1494 = vst [vmem:[#allocation10 + $0xc0] sm:$0xff] %v1803_v26  ;;  %v1806_v29 = vadd.f32 %v1805_v28, %v1804_v27 }
 0x51c   :  { %1495 = vst [vmem:[#allocation10 + $0xc8] sm:$0xff] %v1806_v29 }
 0x51e   :  { %v1807_v30 = vpop.f32.mrb[108].mxu1 }
 0x51f   :  { %v1808_v31 = vpop.f32.mrb[109].mxu1 }
 0x520   :  { %v1809_v32 = vadd.f32 %v1808_v31, %v1807_v30  ;;  %v1810_v34 = vpop.f32.mrb[110].mxu1 }
 0x521   :  { %v1811_v35 = vpop.f32.mrb[111].mxu1 }
 0x522   :  { %1496 = vst [vmem:[#allocation10 + $0xd0] sm:$0xff] %v1809_v32  ;;  %v1812_v36 = vadd.f32 %v1811_v35, %v1810_v34 }
 0x524   :  { %1497 = vst [vmem:[#allocation10 + $0xd8] sm:$0xff] %v1812_v36 }
 0x526   :  { %v1813_v37 = vpop.f32.mrb[112].mxu1 }
 0x527   :  { %v1814_v40 = vpop.f32.mrb[113].mxu1 }
 0x528   :  { %v1815_v41 = vadd.f32 %v1814_v40, %v1813_v37  ;;  %v1816_v44 = vpop.f32.mrb[114].mxu1 }
 0x529   :  { %v1817_v45 = vpop.f32.mrb[115].mxu1 }
 0x52a   :  { %1498 = vst [vmem:[#allocation10 + $0xe0] sm:$0xff] %v1815_v41  ;;  %v1818_v46 = vadd.f32 %v1817_v45, %v1816_v44 }
 0x52c   :  { %1499 = vst [vmem:[#allocation10 + $0xe8] sm:$0xff] %v1818_v46 }
 0x52e   :  { %v1819_v47 = vpop.f32.mrb[116].mxu1 }
 0x52f   :  { %v1820_v48 = vpop.f32.mrb[117].mxu1 }
 0x530   :  { %v1821_v49 = vadd.f32 %v1820_v48, %v1819_v47  ;;  %v1822_v50 = vpop.f32.mrb[118].mxu1 }
 0x531   :  { %v1823_v54 = vpop.f32.mrb[119].mxu1 }
 0x532   :  { %1500 = vst [vmem:[#allocation10 + $0xf0] sm:$0xff] %v1821_v49  ;;  %v1824_v62 = vadd.f32 %v1823_v54, %v1822_v50 }
 0x534   :  { %1501 = vst [vmem:[#allocation10 + $0xf8] sm:$0xff] %v1824_v62 }
 0x535   :  { %2054 = shalt.err (!%p2051_p8)
}
 0x536   :  { %s2055_s17 = scalar_lea.hbm %s2366_s4, 4096 }
 0x537   :  { %p2056_p9 = scmp.ne.s32.totalorder %s2366_s4, %s2055_s17  ;;  %p2059_p10 = scmp.lt.u32.totalorder %s2055_s17, %s2366_s4 }
 0x539   :  { %p2061_p11 = pnand %p2059_p10, %p2056_p9 }
 0x53b   :  { %2064 = shalt.err (!%p2061_p11)
}
 0x53c   :  { %1513 = dma.vmem_to_hbm [thread:$0]  %s1508_s1, 4096, %s2366_s4, [#allocation4], %s2074_s25, %s2074_s25, %s2075_s26  }
 0x53d   :  { %2071 = dma.done.wait [#allocation4], 4096  }
 0x53e   :  { %2072 = vsyncadd [#allocation4], 4294963200 }
 0x53f   :  { %1517 = vsyncpa [#allocation3], 1 }
 0x540   :  { %1518 = vsyncpa [#allocation6], 1 }
 0x541   :  { %1519 = vsyncpa [#allocation9], 1 }
 0x542   :  { %1520 = vsyncpa [#allocation4], 1 }

</bundles_post_ra>
